<compile_context>
chip_gen: v7x
topology: tpu7x:2x2x1
jax: 0.10.0
libtpu: 0.0.40
codegen_flags: <defaults>
</compile_context>

<pallas_src>
import jax
import jax.numpy as jnp
from jax.experimental import pallas as pl
from jax.experimental.pallas import tpu as pltpu


# ----------------------------- tiny T5 config -------------------------------
VOCAB = 64
V_PAD = 128           # vocab padded to one full lane width -> lane-dense stores
D_MODEL = 32          # n_embd
D_KV = 8              # match_n_embd
N_HEADS = 4           # match_n_head
INNER = N_HEADS * D_KV
D_FF = 64
N_ENC_LAYERS = 2
N_DEC_LAYERS = 2      # match_n_layer
REL_BUCKETS = 8
REL_MAX_DIST = 16
LN_EPS = 1e-6
NEG_INF = -1e9


# --------------------------- in-kernel helpers -------------------------------
def _rms(x, w_row):
    # T5LayerNorm: no mean subtraction, no bias (f32 elementwise path).
    var = jnp.mean(x * x, axis=-1, keepdims=True)
    return x * jax.lax.rsqrt(var + LN_EPS) * w_row


def _mm(a, w_bf16):
    # f32 activation x bf16 weight on the MXU with f32 accumulation.
    return jnp.dot(a.astype(jnp.bfloat16), w_bf16,
                   preferred_element_type=jnp.float32)


def _attention(q, k, v, wo_bf16, bias, head_mask, seg_ones):
    """All heads of one batch element in 4 MXU matmuls (no per-head loop).

    q: (Sq, INNER) f32; k, v: (Sk, INNER) f32; wo_bf16: (INNER, D_MODEL) bf16.
    head_mask: (H*Sk, INNER) f32, head_mask[h*Sk+s, h'*D_KV+d] = (h == h').
    seg_ones : (H*Sk, H*Sk) f32 block-diagonal ones (per-head softmax segments).
    bias     : (Sq, H*Sk) additive rel-pos(+causal) bias, or None.
    Returns (Sq, D_MODEL) f32 == concat_h(softmax(q_h k_h^T + b_h) v_h) @ W_o.
    NOTE: T5 does NOT scale scores by 1/sqrt(d_kv).
    """
    k_rep = jnp.concatenate([k] * N_HEADS, axis=0) * head_mask    # (H*Sk, INNER)
    v_rep = jnp.concatenate([v] * N_HEADS, axis=0) * head_mask    # (H*Sk, INNER)
    # scores[s, h*Sk+sk] = q_h[s] . k_h[sk]  (head-masked lane contraction).
    s = jax.lax.dot_general(q.astype(jnp.bfloat16), k_rep.astype(jnp.bfloat16),
                            (((1,), (1,)), ((), ())),
                            preferred_element_type=jnp.float32)   # (Sq, H*Sk)
    if bias is not None:
        s = s + bias
    # Per-head softmax: a per-row (global) max shift is constant within every
    # head segment, so the segmented softmax stays exact; segment sums are
    # broadcast back with one block-diagonal matmul (no lane-splitting reshape).
    m = jnp.max(s, axis=-1, keepdims=True)
    p = jnp.exp(s - m)
    denom = jnp.dot(p, seg_ones, preferred_element_type=jnp.float32)
    p = p / denom
    ctx = jnp.dot(p.astype(jnp.bfloat16), v_rep.astype(jnp.bfloat16),
                  preferred_element_type=jnp.float32)              # (Sq, INNER)
    return jnp.dot(ctx.astype(jnp.bfloat16), wo_bf16,
                   preferred_element_type=jnp.float32)             # (Sq, D_MODEL)


# ------------------------------ fused kernel ----------------------------------
def _t5_kernel(x_ref, y_ref, enc_bias_ref, dec_bias_ref,
               hm_e_ref, seg_e_ref, hm_d_ref, seg_d_ref,
               e_ln1, e_wqkv, e_wo, e_ln2, e_wi, e_woff, e_lnf,
               d_ln1, d_wqkv, d_wo_s, d_ln2, d_wq_c, d_wkv_c, d_wo_c,
               d_ln3, d_wi, d_woff, d_lnf, emb_ref, o_ref):
    # One grid step == one batch element (grid=(B,), "parallel" for v7x 2 TCs).
    # Constant bias / masks loaded once per grid step (hoisted out of loops).
    hm_e, seg_e = hm_e_ref[...], seg_e_ref[...]
    hm_d, seg_d = hm_d_ref[...], seg_d_ref[...]
    enc_bias = enc_bias_ref[...]
    dec_bias = dec_bias_ref[...]

    # ------------------------------ encoder ----------------------------------
    x = x_ref[...]                                                 # (S_enc, D)
    for l in range(N_ENC_LAYERS):
        h = _rms(x, e_ln1[pl.ds(l, 1), :])
        qkv = _mm(h, e_wqkv[l])                                    # (S_enc, 3*INNER)
        x = x + _attention(qkv[:, :INNER], qkv[:, INNER:2 * INNER],
                           qkv[:, 2 * INNER:], e_wo[l], enc_bias, hm_e, seg_e)
        h = _rms(x, e_ln2[pl.ds(l, 1), :])
        x = x + _mm(jnp.maximum(_mm(h, e_wi[l]), 0.0), e_woff[l])
    enc = _rms(x, e_lnf[...])                                      # encoder final norm

    # ------------------------------ decoder ----------------------------------
    y = y_ref[...]                                                 # (S_dec, D)
    for l in range(N_DEC_LAYERS):
        # causal self-attention (rel-pos bias + causal mask folded into dec_bias)
        h = _rms(y, d_ln1[pl.ds(l, 1), :])
        qkv = _mm(h, d_wqkv[l])
        y = y + _attention(qkv[:, :INNER], qkv[:, INNER:2 * INNER],
                           qkv[:, 2 * INNER:], d_wo_s[l], dec_bias, hm_d, seg_d)
        # cross-attention (K/V from encoder output; zero bias in T5)
        h = _rms(y, d_ln2[pl.ds(l, 1), :])
        q_c = _mm(h, d_wq_c[l])
        kv_c = _mm(enc, d_wkv_c[l])
        y = y + _attention(q_c, kv_c[:, :INNER], kv_c[:, INNER:],
                           d_wo_c[l], None, hm_e, seg_e)
        # feed-forward (ReLU)
        h = _rms(y, d_ln3[pl.ds(l, 1), :])
        y = y + _mm(jnp.maximum(_mm(h, d_wi[l]), 0.0), d_woff[l])

    # final RMSNorm + tied LM head (rescaled by d_model**-0.5); contracts the
    # embedding axis of the single shared table (no pre-transposed copy).
    # Vocab is padded to 128 so this store is a full-lane unmasked vst.
    yf = _rms(y, d_lnf[...]) * (D_MODEL ** -0.5)
    o_ref[...] = jax.lax.dot_general(
        yf.astype(jnp.bfloat16), emb_ref[...],
        (((1,), (1,)), ((), ())), preferred_element_type=jnp.float32)


# ------------------------------ JAX glue (T5) ---------------------------------
def _relative_position_bucket(rel_pos, bidirectional, num_buckets, max_distance):
    rel_pos = rel_pos.astype(jnp.int32)
    rel_buckets = jnp.zeros_like(rel_pos)
    if bidirectional:
        num_buckets = num_buckets // 2
        rel_buckets = rel_buckets + (rel_pos > 0).astype(jnp.int32) * num_buckets
        rel_pos = jnp.abs(rel_pos)
    else:
        rel_pos = -jnp.minimum(rel_pos, 0)
    max_exact = num_buckets // 2
    is_small = rel_pos < max_exact
    rp_f = jnp.maximum(rel_pos, 1).astype(jnp.float32)
    rel_if_large = max_exact + (
        jnp.log(rp_f / max_exact) / jnp.log(max_distance / max_exact)
        * (num_buckets - max_exact)
    ).astype(jnp.int32)
    rel_if_large = jnp.minimum(rel_if_large, num_buckets - 1)
    return rel_buckets + jnp.where(is_small, rel_pos, rel_if_large)


def _bias_big(q_len, k_len, table, *, bidirectional, causal):
    """Relative-position bias rearranged to (q_len, H*k_len); optional causal."""
    ctx = jnp.arange(q_len, dtype=jnp.int32)[:, None]
    mem = jnp.arange(k_len, dtype=jnp.int32)[None, :]
    buckets = _relative_position_bucket(mem - ctx, bidirectional,
                                        REL_BUCKETS, REL_MAX_DIST)
    vals = table[buckets]                           # (q, k, H)
    bias = jnp.transpose(vals, (0, 2, 1))           # (q, H, k)
    if causal:
        cmask = jnp.where(ctx >= mem, 0.0, NEG_INF).astype(jnp.float32)  # (q, k)
        bias = bias + cmask[:, None, :]
    return bias.reshape(q_len, N_HEADS * k_len).astype(jnp.float32)


def _head_mask(sk):
    # (H*sk, INNER): 1.0 where the row's head == the lane's head, else 0.
    r = jnp.arange(N_HEADS * sk)[:, None] // sk
    c = jnp.arange(INNER)[None, :] // D_KV
    return (r == c).astype(jnp.float32)


def _seg_ones(sk):
    # (H*sk, H*sk) block-diagonal ones: per-head softmax segment sums.
    n = N_HEADS * sk
    r = jnp.arange(n)[:, None] // sk
    c = jnp.arange(n)[None, :] // sk
    return (r == c).astype(jnp.float32)


def _rep_spec(arr):
    # Full-array block, same (index-0) block for every grid step.
    nd = arr.ndim
    return pl.BlockSpec(arr.shape, lambda b, _n=nd: (0,) * _n)


@jax.jit
def t5_forward(input_ids, decoder_input_ids, params):
    """Returns lm_logits (B, S_dec, VOCAB).  No labels -> no loss computation."""
    B, S_enc = input_ids.shape
    _, S_dec = decoder_input_ids.shape
    shared = params["shared"]                                      # (V_PAD, D) bf16
    x = shared[input_ids].astype(jnp.float32).reshape(B * S_enc, D_MODEL)
    y = shared[decoder_input_ids].astype(jnp.float32).reshape(B * S_dec, D_MODEL)

    enc_bias = _bias_big(S_enc, S_enc, params["enc_rel_bias"],
                         bidirectional=True, causal=False)         # (S_enc, H*S_enc)
    dec_bias = _bias_big(S_dec, S_dec, params["dec_rel_bias"],
                         bidirectional=False, causal=True)         # (S_dec, H*S_dec)
    hm_e, seg_e = _head_mask(S_enc), _seg_ones(S_enc)
    hm_d, seg_d = _head_mask(S_dec), _seg_ones(S_dec)

    e, d = params["enc"], params["dec"]
    args = (x, y, enc_bias, dec_bias, hm_e, seg_e, hm_d, seg_d,
            e["ln1"], e["wqkv"], e["wo"], e["ln2"], e["wi"], e["wo_ff"], e["ln_f"],
            d["ln1"], d["wqkv"], d["wo_self"], d["ln2"], d["wq_c"], d["wkv_c"],
            d["wo_c"], d["ln3"], d["wi"], d["wo_ff"], d["ln_f"], shared)
    in_specs = ([pl.BlockSpec((S_enc, D_MODEL), lambda b: (b, 0)),
                 pl.BlockSpec((S_dec, D_MODEL), lambda b: (b, 0))]
                + [_rep_spec(a) for a in args[2:]])

    logits_pad = pl.pallas_call(
        _t5_kernel,
        out_shape=jax.ShapeDtypeStruct((B * S_dec, V_PAD), jnp.float32),
        grid=(B,),
        in_specs=in_specs,
        out_specs=pl.BlockSpec((S_dec, V_PAD), lambda b: (b, 0)),
        compiler_params=pltpu.CompilerParams(
            dimension_semantics=("parallel",)),
    )(*args)
    return logits_pad[:, :VOCAB].reshape(B, S_dec, VOCAB)


# ---------------------------- parameter init ---------------------------------
def init_params(key):
    scale = 0.05
    keys = iter(jax.random.split(key, 32))

    def nrm(shape, dtype=jnp.bfloat16):
        return (jax.random.normal(next(keys), shape, jnp.float32) * scale).astype(dtype)

    def ln_ones(n):
        return jnp.ones((n, D_MODEL), jnp.float32)

    emb = jax.random.normal(next(keys), (VOCAB, D_MODEL), jnp.float32) * scale
    # tie_word_embeddings: single shared table (bf16), vocab padded to 128 rows
    # (padding rows are zero => padded logit columns are zero and sliced off).
    shared = jnp.zeros((V_PAD, D_MODEL), jnp.float32).at[:VOCAB].set(emb)

    params = {
        "shared": shared.astype(jnp.bfloat16),
        "enc_rel_bias": nrm((REL_BUCKETS, N_HEADS), jnp.float32),
        "dec_rel_bias": nrm((REL_BUCKETS, N_HEADS), jnp.float32),
        "enc": {
            "ln1": ln_ones(N_ENC_LAYERS),
            "wqkv": nrm((N_ENC_LAYERS, D_MODEL, 3 * INNER)),      # fused Q|K|V
            "wo": nrm((N_ENC_LAYERS, INNER, D_MODEL)),
            "ln2": ln_ones(N_ENC_LAYERS),
            "wi": nrm((N_ENC_LAYERS, D_MODEL, D_FF)),
            "wo_ff": nrm((N_ENC_LAYERS, D_FF, D_MODEL)),
            "ln_f": jnp.ones((1, D_MODEL), jnp.float32),
        },
        "dec": {
            "ln1": ln_ones(N_DEC_LAYERS),
            "wqkv": nrm((N_DEC_LAYERS, D_MODEL, 3 * INNER)),
            "wo_self": nrm((N_DEC_LAYERS, INNER, D_MODEL)),
            "ln2": ln_ones(N_DEC_LAYERS),
            "wq_c": nrm((N_DEC_LAYERS, D_MODEL, INNER)),
            "wkv_c": nrm((N_DEC_LAYERS, D_MODEL, 2 * INNER)),     # fused K|V (cross)
            "wo_c": nrm((N_DEC_LAYERS, INNER, D_MODEL)),
            "ln3": ln_ones(N_DEC_LAYERS),
            "wi": nrm((N_DEC_LAYERS, D_MODEL, D_FF)),
            "wo_ff": nrm((N_DEC_LAYERS, D_FF, D_MODEL)),
            "ln_f": jnp.ones((1, D_MODEL), jnp.float32),
        },
    }
    return params


# TODO(synk): tokenizer loading, checkpoint loading, prompt-dropout (training
# mode), label/loss computation and generate() have no in-kernel equivalent
# and are omitted.

if __name__ == "__main__":
    key = jax.random.PRNGKey(0)
    k_params, k_enc, k_dec = jax.random.split(key, 3)
    params = init_params(k_params)

    B, S_ENC, S_DEC = 2, 8, 8
    input_ids = jax.random.randint(k_enc, (B, S_ENC), 0, VOCAB, jnp.int32)
    decoder_input_ids = jax.random.randint(k_dec, (B, S_DEC), 0, VOCAB, jnp.int32)

    logits = t5_forward(input_ids, decoder_input_ids, params)
    jax.block_until_ready(logits)
    assert logits.shape == (B, S_DEC, VOCAB)
    assert bool(jnp.all(jnp.isfinite(logits)))
    print("KERNEL_OK")
</pallas_src>

<mosaic_0001>
module attributes {stable_mosaic.version = 11 : i64} {
  func.func @_t5_kernel(%arg0: i32, %arg1: memref<8x32xf32, #tpu.memory_space<vmem>>, %arg2: memref<8x32xf32, #tpu.memory_space<vmem>>, %arg3: memref<8x32xf32, #tpu.memory_space<vmem>>, %arg4: memref<8x32xf32, #tpu.memory_space<vmem>>, %arg5: memref<32x32xf32, #tpu.memory_space<vmem>>, %arg6: memref<32x32xf32, #tpu.memory_space<vmem>>, %arg7: memref<32x32xf32, #tpu.memory_space<vmem>>, %arg8: memref<32x32xf32, #tpu.memory_space<vmem>>, %arg9: memref<2x32xf32, #tpu.memory_space<vmem>>, %arg10: memref<2x32x96xbf16, #tpu.memory_space<vmem>>, %arg11: memref<2x32x32xbf16, #tpu.memory_space<vmem>>, %arg12: memref<2x32xf32, #tpu.memory_space<vmem>>, %arg13: memref<2x32x64xbf16, #tpu.memory_space<vmem>>, %arg14: memref<2x64x32xbf16, #tpu.memory_space<vmem>>, %arg15: memref<1x32xf32, #tpu.memory_space<vmem>>, %arg16: memref<2x32xf32, #tpu.memory_space<vmem>>, %arg17: memref<2x32x96xbf16, #tpu.memory_space<vmem>>, %arg18: memref<2x32x32xbf16, #tpu.memory_space<vmem>>, %arg19: memref<2x32xf32, #tpu.memory_space<vmem>>, %arg20: memref<2x32x32xbf16, #tpu.memory_space<vmem>>, %arg21: memref<2x32x64xbf16, #tpu.memory_space<vmem>>, %arg22: memref<2x32x32xbf16, #tpu.memory_space<vmem>>, %arg23: memref<2x32xf32, #tpu.memory_space<vmem>>, %arg24: memref<2x32x64xbf16, #tpu.memory_space<vmem>>, %arg25: memref<2x64x32xbf16, #tpu.memory_space<vmem>>, %arg26: memref<1x32xf32, #tpu.memory_space<vmem>>, %arg27: memref<128x32xbf16, #tpu.memory_space<vmem>>, %arg28: memref<8x128xf32, #tpu.memory_space<vmem>>) attributes {dimension_semantics = [#tpu.dimension_semantics<parallel>], iteration_bounds = array<i64: 2>, scalar_prefetch = 0 : i64, scratch_operands = 0 : i64, tpu.core_type = #tpu.core_type<tc>, window_params = [{transform_indices = @transform_0, window_bounds = array<i64: 8, 32>}, {transform_indices = @transform_1, window_bounds = array<i64: 8, 32>}, {pipeline_mode = #tpu.pipeline_mode<synchronous>, transform_indices = @transform_2, window_bounds = array<i64: 8, 32>}, {pipeline_mode = #tpu.pipeline_mode<synchronous>, transform_indices = @transform_3, window_bounds = array<i64: 8, 32>}, {pipeline_mode = #tpu.pipeline_mode<synchronous>, transform_indices = @transform_4, window_bounds = array<i64: 32, 32>}, {pipeline_mode = #tpu.pipeline_mode<synchronous>, transform_indices = @transform_5, window_bounds = array<i64: 32, 32>}, {pipeline_mode = #tpu.pipeline_mode<synchronous>, transform_indices = @transform_6, window_bounds = array<i64: 32, 32>}, {pipeline_mode = #tpu.pipeline_mode<synchronous>, transform_indices = @transform_7, window_bounds = array<i64: 32, 32>}, {pipeline_mode = #tpu.pipeline_mode<synchronous>, transform_indices = @transform_8, window_bounds = array<i64: 2, 32>}, {pipeline_mode = #tpu.pipeline_mode<synchronous>, transform_indices = @transform_9, window_bounds = array<i64: 2, 32, 96>}, {pipeline_mode = #tpu.pipeline_mode<synchronous>, transform_indices = @transform_10, window_bounds = array<i64: 2, 32, 32>}, {pipeline_mode = #tpu.pipeline_mode<synchronous>, transform_indices = @transform_11, window_bounds = array<i64: 2, 32>}, {pipeline_mode = #tpu.pipeline_mode<synchronous>, transform_indices = @transform_12, window_bounds = array<i64: 2, 32, 64>}, {pipeline_mode = #tpu.pipeline_mode<synchronous>, transform_indices = @transform_13, window_bounds = array<i64: 2, 64, 32>}, {pipeline_mode = #tpu.pipeline_mode<synchronous>, transform_indices = @transform_14, window_bounds = array<i64: 1, 32>}, {pipeline_mode = #tpu.pipeline_mode<synchronous>, transform_indices = @transform_15, window_bounds = array<i64: 2, 32>}, {pipeline_mode = #tpu.pipeline_mode<synchronous>, transform_indices = @transform_16, window_bounds = array<i64: 2, 32, 96>}, {pipeline_mode = #tpu.pipeline_mode<synchronous>, transform_indices = @transform_17, window_bounds = array<i64: 2, 32, 32>}, {pipeline_mode = #tpu.pipeline_mode<synchronous>, transform_indices = @transform_18, window_bounds = array<i64: 2, 32>}, {pipeline_mode = #tpu.pipeline_mode<synchronous>, transform_indices = @transform_19, window_bounds = array<i64: 2, 32, 32>}, {pipeline_mode = #tpu.pipeline_mode<synchronous>, transform_indices = @transform_20, window_bounds = array<i64: 2, 32, 64>}, {pipeline_mode = #tpu.pipeline_mode<synchronous>, transform_indices = @transform_21, window_bounds = array<i64: 2, 32, 32>}, {pipeline_mode = #tpu.pipeline_mode<synchronous>, transform_indices = @transform_22, window_bounds = array<i64: 2, 32>}, {pipeline_mode = #tpu.pipeline_mode<synchronous>, transform_indices = @transform_23, window_bounds = array<i64: 2, 32, 64>}, {pipeline_mode = #tpu.pipeline_mode<synchronous>, transform_indices = @transform_24, window_bounds = array<i64: 2, 64, 32>}, {pipeline_mode = #tpu.pipeline_mode<synchronous>, transform_indices = @transform_25, window_bounds = array<i64: 1, 32>}, {pipeline_mode = #tpu.pipeline_mode<synchronous>, transform_indices = @transform_26, window_bounds = array<i64: 128, 32>}, {transform_indices = @transform_27, window_bounds = array<i64: 8, 128>}]} {
    %c0 = arith.constant 0 : index
    %c0_0 = arith.constant 0 : index
    %0 = vector.load %arg5[%c0, %c0_0] : memref<32x32xf32, #tpu.memory_space<vmem>>, vector<32x32xf32>
    %c0_1 = arith.constant 0 : index
    %c0_2 = arith.constant 0 : index
    %1 = vector.load %arg6[%c0_1, %c0_2] : memref<32x32xf32, #tpu.memory_space<vmem>>, vector<32x32xf32>
    %c0_3 = arith.constant 0 : index
    %c0_4 = arith.constant 0 : index
    %2 = vector.load %arg7[%c0_3, %c0_4] : memref<32x32xf32, #tpu.memory_space<vmem>>, vector<32x32xf32>
    %c0_5 = arith.constant 0 : index
    %c0_6 = arith.constant 0 : index
    %3 = vector.load %arg8[%c0_5, %c0_6] : memref<32x32xf32, #tpu.memory_space<vmem>>, vector<32x32xf32>
    %c0_7 = arith.constant 0 : index
    %c0_8 = arith.constant 0 : index
    %4 = vector.load %arg3[%c0_7, %c0_8] : memref<8x32xf32, #tpu.memory_space<vmem>>, vector<8x32xf32>
    %c0_9 = arith.constant 0 : index
    %c0_10 = arith.constant 0 : index
    %5 = vector.load %arg4[%c0_9, %c0_10] : memref<8x32xf32, #tpu.memory_space<vmem>>, vector<8x32xf32>
    %c0_11 = arith.constant 0 : index
    %c0_12 = arith.constant 0 : index
    %6 = vector.load %arg1[%c0_11, %c0_12] : memref<8x32xf32, #tpu.memory_space<vmem>>, vector<8x32xf32>
    %c0_13 = arith.constant 0 : index
    %c0_14 = arith.constant 0 : index
    %7 = vector.load %arg9[%c0_13, %c0_14] : memref<2x32xf32, #tpu.memory_space<vmem>>, vector<1x32xf32>
    %8 = arith.mulf %6, %6 : vector<8x32xf32>
    %cst = arith.constant dense<0.000000e+00> : vector<8xf32>
    %9 = vector.multi_reduction <add>, %8, %cst [1] : vector<8x32xf32> to vector<8xf32>
    %10 = vector.shape_cast %9 : vector<8xf32> to vector<8x1xf32>
    %cst_15 = arith.constant 3.200000e+01 : f32
    %11 = vector.broadcast %cst_15 : f32 to vector<8x1xf32>
    %12 = arith.divf %10, %11 : vector<8x1xf32>
    %cst_16 = arith.constant 9.99999997E-7 : f32
    %13 = vector.broadcast %cst_16 : f32 to vector<8x1xf32>
    %14 = arith.addf %12, %13 : vector<8x1xf32>
    %15 = math.rsqrt %14 : vector<8x1xf32>
    %16 = vector.broadcast %15 : vector<8x1xf32> to vector<8x32xf32>
    %17 = arith.mulf %6, %16 : vector<8x32xf32>
    %18 = vector.broadcast %7 : vector<1x32xf32> to vector<8x32xf32>
    %19 = arith.mulf %17, %18 : vector<8x32xf32>
    %c0_17 = arith.constant 0 : index
    %c0_18 = arith.constant 0 : index
    %c0_19 = arith.constant 0 : index
    %20 = vector.load %arg10[%c0_17, %c0_18, %c0_19] : memref<2x32x96xbf16, #tpu.memory_space<vmem>>, vector<1x32x96xbf16>
    %21 = vector.shape_cast %20 : vector<1x32x96xbf16> to vector<32x96xbf16>
    %22 = arith.truncf %19 : vector<8x32xf32> to vector<8x32xbf16>
    %cst_20 = arith.constant dense<0.000000e+00> : vector<8x96xf32>
    %23 = tpu.matmul %22, %21, %cst_20 {dimension_numbers = #tpu.dot_dimension_numbers<[1], [0], [0], [1], [0, 0, 1, 1], [], []>} : vector<8x32xbf16>, vector<32x96xbf16>, vector<8x96xf32> -> vector<8x96xf32>
    %24 = vector.extract_strided_slice %23 {offsets = [0, 0], sizes = [8, 32], strides = [1, 1]} : vector<8x96xf32> to vector<8x32xf32>
    %25 = vector.extract_strided_slice %23 {offsets = [0, 32], sizes = [8, 32], strides = [1, 1]} : vector<8x96xf32> to vector<8x32xf32>
    %26 = vector.extract_strided_slice %23 {offsets = [0, 64], sizes = [8, 32], strides = [1, 1]} : vector<8x96xf32> to vector<8x32xf32>
    %c0_21 = arith.constant 0 : index
    %c0_22 = arith.constant 0 : index
    %c0_23 = arith.constant 0 : index
    %27 = vector.load %arg11[%c0_21, %c0_22, %c0_23] : memref<2x32x32xbf16, #tpu.memory_space<vmem>>, vector<1x32x32xbf16>
    %28 = vector.shape_cast %27 : vector<1x32x32xbf16> to vector<32x32xbf16>
    %29 = tpu.concatenate %25, %25, %25, %25 in 0 : vector<8x32xf32>, vector<8x32xf32>, vector<8x32xf32>, vector<8x32xf32> -> vector<32x32xf32>
    %30 = arith.mulf %29, %0 : vector<32x32xf32>
    %31 = tpu.concatenate %26, %26, %26, %26 in 0 : vector<8x32xf32>, vector<8x32xf32>, vector<8x32xf32>, vector<8x32xf32> -> vector<32x32xf32>
    %32 = arith.mulf %31, %0 : vector<32x32xf32>
    %33 = arith.truncf %24 : vector<8x32xf32> to vector<8x32xbf16>
    %34 = arith.truncf %30 : vector<32x32xf32> to vector<32x32xbf16>
    %cst_24 = arith.constant dense<0.000000e+00> : vector<8x32xf32>
    %35 = tpu.matmul %33, %34, %cst_24 {dimension_numbers = #tpu.dot_dimension_numbers<[1], [1], [0], [0], [0, 0, 1, 0], [], []>} : vector<8x32xbf16>, vector<32x32xbf16>, vector<8x32xf32> -> vector<8x32xf32>
    %36 = arith.addf %35, %4 : vector<8x32xf32>
    %cst_25 = arith.constant dense<0xFF800000> : vector<8xf32>
    %37 = vector.multi_reduction <maximumf>, %36, %cst_25 [1] : vector<8x32xf32> to vector<8xf32>
    %38 = vector.shape_cast %37 : vector<8xf32> to vector<8x1xf32>
    %39 = vector.broadcast %38 : vector<8x1xf32> to vector<8x32xf32>
    %40 = arith.subf %36, %39 : vector<8x32xf32>
    %41 = math.exp %40 : vector<8x32xf32>
    %cst_26 = arith.constant dense<0.000000e+00> : vector<8x32xf32>
    %42 = tpu.matmul %41, %1, %cst_26 {dimension_numbers = #tpu.dot_dimension_numbers<[1], [0], [0], [1], [0, 0, 1, 1], [], []>} : vector<8x32xf32>, vector<32x32xf32>, vector<8x32xf32> -> vector<8x32xf32>
    %43 = arith.divf %41, %42 : vector<8x32xf32>
    %44 = arith.truncf %43 : vector<8x32xf32> to vector<8x32xbf16>
    %45 = arith.truncf %32 : vector<32x32xf32> to vector<32x32xbf16>
    %cst_27 = arith.constant dense<0.000000e+00> : vector<8x32xf32>
    %46 = tpu.matmul %44, %45, %cst_27 {dimension_numbers = #tpu.dot_dimension_numbers<[1], [0], [0], [1], [0, 0, 1, 1], [], []>} : vector<8x32xbf16>, vector<32x32xbf16>, vector<8x32xf32> -> vector<8x32xf32>
    %47 = arith.truncf %46 : vector<8x32xf32> to vector<8x32xbf16>
    %cst_28 = arith.constant dense<0.000000e+00> : vector<8x32xf32>
    %48 = tpu.matmul %47, %28, %cst_28 {dimension_numbers = #tpu.dot_dimension_numbers<[1], [0], [0], [1], [0, 0, 1, 1], [], []>} : vector<8x32xbf16>, vector<32x32xbf16>, vector<8x32xf32> -> vector<8x32xf32>
    %49 = arith.addf %6, %48 : vector<8x32xf32>
    %c0_29 = arith.constant 0 : index
    %c0_30 = arith.constant 0 : index
    %50 = vector.load %arg12[%c0_29, %c0_30] : memref<2x32xf32, #tpu.memory_space<vmem>>, vector<1x32xf32>
    %51 = arith.mulf %49, %49 : vector<8x32xf32>
    %cst_31 = arith.constant dense<0.000000e+00> : vector<8xf32>
    %52 = vector.multi_reduction <add>, %51, %cst_31 [1] : vector<8x32xf32> to vector<8xf32>
    %53 = vector.shape_cast %52 : vector<8xf32> to vector<8x1xf32>
    %cst_32 = arith.constant 3.200000e+01 : f32
    %54 = vector.broadcast %cst_32 : f32 to vector<8x1xf32>
    %55 = arith.divf %53, %54 : vector<8x1xf32>
    %cst_33 = arith.constant 9.99999997E-7 : f32
    %56 = vector.broadcast %cst_33 : f32 to vector<8x1xf32>
    %57 = arith.addf %55, %56 : vector<8x1xf32>
    %58 = math.rsqrt %57 : vector<8x1xf32>
    %59 = vector.broadcast %58 : vector<8x1xf32> to vector<8x32xf32>
    %60 = arith.mulf %49, %59 : vector<8x32xf32>
    %61 = vector.broadcast %50 : vector<1x32xf32> to vector<8x32xf32>
    %62 = arith.mulf %60, %61 : vector<8x32xf32>
    %c0_34 = arith.constant 0 : index
    %c0_35 = arith.constant 0 : index
    %c0_36 = arith.constant 0 : index
    %63 = vector.load %arg13[%c0_34, %c0_35, %c0_36] : memref<2x32x64xbf16, #tpu.memory_space<vmem>>, vector<1x32x64xbf16>
    %64 = vector.shape_cast %63 : vector<1x32x64xbf16> to vector<32x64xbf16>
    %65 = arith.truncf %62 : vector<8x32xf32> to vector<8x32xbf16>
    %cst_37 = arith.constant dense<0.000000e+00> : vector<8x64xf32>
    %66 = tpu.matmul %65, %64, %cst_37 {dimension_numbers = #tpu.dot_dimension_numbers<[1], [0], [0], [1], [0, 0, 1, 1], [], []>} : vector<8x32xbf16>, vector<32x64xbf16>, vector<8x64xf32> -> vector<8x64xf32>
    %cst_38 = arith.constant 0.000000e+00 : f32
    %67 = vector.broadcast %cst_38 : f32 to vector<8x64xf32>
    %68 = arith.maximumf %66, %67 : vector<8x64xf32>
    %c0_39 = arith.constant 0 : index
    %c0_40 = arith.constant 0 : index
    %c0_41 = arith.constant 0 : index
    %69 = vector.load %arg14[%c0_39, %c0_40, %c0_41] : memref<2x64x32xbf16, #tpu.memory_space<vmem>>, vector<1x64x32xbf16>
    %70 = vector.shape_cast %69 : vector<1x64x32xbf16> to vector<64x32xbf16>
    %71 = arith.truncf %68 : vector<8x64xf32> to vector<8x64xbf16>
    %cst_42 = arith.constant dense<0.000000e+00> : vector<8x32xf32>
    %72 = tpu.matmul %71, %70, %cst_42 {dimension_numbers = #tpu.dot_dimension_numbers<[1], [0], [0], [1], [0, 0, 1, 1], [], []>} : vector<8x64xbf16>, vector<64x32xbf16>, vector<8x32xf32> -> vector<8x32xf32>
    %73 = arith.addf %49, %72 : vector<8x32xf32>
    %c1 = arith.constant 1 : index
    %c0_43 = arith.constant 0 : index
    %74 = vector.load %arg9[%c1, %c0_43] : memref<2x32xf32, #tpu.memory_space<vmem>>, vector<1x32xf32>
    %75 = arith.mulf %73, %73 : vector<8x32xf32>
    %cst_44 = arith.constant dense<0.000000e+00> : vector<8xf32>
    %76 = vector.multi_reduction <add>, %75, %cst_44 [1] : vector<8x32xf32> to vector<8xf32>
    %77 = vector.shape_cast %76 : vector<8xf32> to vector<8x1xf32>
    %cst_45 = arith.constant 3.200000e+01 : f32
    %78 = vector.broadcast %cst_45 : f32 to vector<8x1xf32>
    %79 = arith.divf %77, %78 : vector<8x1xf32>
    %cst_46 = arith.constant 9.99999997E-7 : f32
    %80 = vector.broadcast %cst_46 : f32 to vector<8x1xf32>
    %81 = arith.addf %79, %80 : vector<8x1xf32>
    %82 = math.rsqrt %81 : vector<8x1xf32>
    %83 = vector.broadcast %82 : vector<8x1xf32> to vector<8x32xf32>
    %84 = arith.mulf %73, %83 : vector<8x32xf32>
    %85 = vector.broadcast %74 : vector<1x32xf32> to vector<8x32xf32>
    %86 = arith.mulf %84, %85 : vector<8x32xf32>
    %c1_47 = arith.constant 1 : index
    %c0_48 = arith.constant 0 : index
    %c0_49 = arith.constant 0 : index
    %87 = vector.load %arg10[%c1_47, %c0_48, %c0_49] : memref<2x32x96xbf16, #tpu.memory_space<vmem>>, vector<1x32x96xbf16>
    %88 = vector.shape_cast %87 : vector<1x32x96xbf16> to vector<32x96xbf16>
    %89 = arith.truncf %86 : vector<8x32xf32> to vector<8x32xbf16>
    %cst_50 = arith.constant dense<0.000000e+00> : vector<8x96xf32>
    %90 = tpu.matmul %89, %88, %cst_50 {dimension_numbers = #tpu.dot_dimension_numbers<[1], [0], [0], [1], [0, 0, 1, 1], [], []>} : vector<8x32xbf16>, vector<32x96xbf16>, vector<8x96xf32> -> vector<8x96xf32>
    %91 = vector.extract_strided_slice %90 {offsets = [0, 0], sizes = [8, 32], strides = [1, 1]} : vector<8x96xf32> to vector<8x32xf32>
    %92 = vector.extract_strided_slice %90 {offsets = [0, 32], sizes = [8, 32], strides = [1, 1]} : vector<8x96xf32> to vector<8x32xf32>
    %93 = vector.extract_strided_slice %90 {offsets = [0, 64], sizes = [8, 32], strides = [1, 1]} : vector<8x96xf32> to vector<8x32xf32>
    %c1_51 = arith.constant 1 : index
    %c0_52 = arith.constant 0 : index
    %c0_53 = arith.constant 0 : index
    %94 = vector.load %arg11[%c1_51, %c0_52, %c0_53] : memref<2x32x32xbf16, #tpu.memory_space<vmem>>, vector<1x32x32xbf16>
    %95 = vector.shape_cast %94 : vector<1x32x32xbf16> to vector<32x32xbf16>
    %96 = tpu.concatenate %92, %92, %92, %92 in 0 : vector<8x32xf32>, vector<8x32xf32>, vector<8x32xf32>, vector<8x32xf32> -> vector<32x32xf32>
    %97 = arith.mulf %96, %0 : vector<32x32xf32>
    %98 = tpu.concatenate %93, %93, %93, %93 in 0 : vector<8x32xf32>, vector<8x32xf32>, vector<8x32xf32>, vector<8x32xf32> -> vector<32x32xf32>
    %99 = arith.mulf %98, %0 : vector<32x32xf32>
    %100 = arith.truncf %91 : vector<8x32xf32> to vector<8x32xbf16>
    %101 = arith.truncf %97 : vector<32x32xf32> to vector<32x32xbf16>
    %cst_54 = arith.constant dense<0.000000e+00> : vector<8x32xf32>
    %102 = tpu.matmul %100, %101, %cst_54 {dimension_numbers = #tpu.dot_dimension_numbers<[1], [1], [0], [0], [0, 0, 1, 0], [], []>} : vector<8x32xbf16>, vector<32x32xbf16>, vector<8x32xf32> -> vector<8x32xf32>
    %103 = arith.addf %102, %4 : vector<8x32xf32>
    %cst_55 = arith.constant dense<0xFF800000> : vector<8xf32>
    %104 = vector.multi_reduction <maximumf>, %103, %cst_55 [1] : vector<8x32xf32> to vector<8xf32>
    %105 = vector.shape_cast %104 : vector<8xf32> to vector<8x1xf32>
    %106 = vector.broadcast %105 : vector<8x1xf32> to vector<8x32xf32>
    %107 = arith.subf %103, %106 : vector<8x32xf32>
    %108 = math.exp %107 : vector<8x32xf32>
    %cst_56 = arith.constant dense<0.000000e+00> : vector<8x32xf32>
    %109 = tpu.matmul %108, %1, %cst_56 {dimension_numbers = #tpu.dot_dimension_numbers<[1], [0], [0], [1], [0, 0, 1, 1], [], []>} : vector<8x32xf32>, vector<32x32xf32>, vector<8x32xf32> -> vector<8x32xf32>
    %110 = arith.divf %108, %109 : vector<8x32xf32>
    %111 = arith.truncf %110 : vector<8x32xf32> to vector<8x32xbf16>
    %112 = arith.truncf %99 : vector<32x32xf32> to vector<32x32xbf16>
    %cst_57 = arith.constant dense<0.000000e+00> : vector<8x32xf32>
    %113 = tpu.matmul %111, %112, %cst_57 {dimension_numbers = #tpu.dot_dimension_numbers<[1], [0], [0], [1], [0, 0, 1, 1], [], []>} : vector<8x32xbf16>, vector<32x32xbf16>, vector<8x32xf32> -> vector<8x32xf32>
    %114 = arith.truncf %113 : vector<8x32xf32> to vector<8x32xbf16>
    %cst_58 = arith.constant dense<0.000000e+00> : vector<8x32xf32>
    %115 = tpu.matmul %114, %95, %cst_58 {dimension_numbers = #tpu.dot_dimension_numbers<[1], [0], [0], [1], [0, 0, 1, 1], [], []>} : vector<8x32xbf16>, vector<32x32xbf16>, vector<8x32xf32> -> vector<8x32xf32>
    %116 = arith.addf %73, %115 : vector<8x32xf32>
    %c1_59 = arith.constant 1 : index
    %c0_60 = arith.constant 0 : index
    %117 = vector.load %arg12[%c1_59, %c0_60] : memref<2x32xf32, #tpu.memory_space<vmem>>, vector<1x32xf32>
    %118 = arith.mulf %116, %116 : vector<8x32xf32>
    %cst_61 = arith.constant dense<0.000000e+00> : vector<8xf32>
    %119 = vector.multi_reduction <add>, %118, %cst_61 [1] : vector<8x32xf32> to vector<8xf32>
    %120 = vector.shape_cast %119 : vector<8xf32> to vector<8x1xf32>
    %cst_62 = arith.constant 3.200000e+01 : f32
    %121 = vector.broadcast %cst_62 : f32 to vector<8x1xf32>
    %122 = arith.divf %120, %121 : vector<8x1xf32>
    %cst_63 = arith.constant 9.99999997E-7 : f32
    %123 = vector.broadcast %cst_63 : f32 to vector<8x1xf32>
    %124 = arith.addf %122, %123 : vector<8x1xf32>
    %125 = math.rsqrt %124 : vector<8x1xf32>
    %126 = vector.broadcast %125 : vector<8x1xf32> to vector<8x32xf32>
    %127 = arith.mulf %116, %126 : vector<8x32xf32>
    %128 = vector.broadcast %117 : vector<1x32xf32> to vector<8x32xf32>
    %129 = arith.mulf %127, %128 : vector<8x32xf32>
    %c1_64 = arith.constant 1 : index
    %c0_65 = arith.constant 0 : index
    %c0_66 = arith.constant 0 : index
    %130 = vector.load %arg13[%c1_64, %c0_65, %c0_66] : memref<2x32x64xbf16, #tpu.memory_space<vmem>>, vector<1x32x64xbf16>
    %131 = vector.shape_cast %130 : vector<1x32x64xbf16> to vector<32x64xbf16>
    %132 = arith.truncf %129 : vector<8x32xf32> to vector<8x32xbf16>
    %cst_67 = arith.constant dense<0.000000e+00> : vector<8x64xf32>
    %133 = tpu.matmul %132, %131, %cst_67 {dimension_numbers = #tpu.dot_dimension_numbers<[1], [0], [0], [1], [0, 0, 1, 1], [], []>} : vector<8x32xbf16>, vector<32x64xbf16>, vector<8x64xf32> -> vector<8x64xf32>
    %cst_68 = arith.constant 0.000000e+00 : f32
    %134 = vector.broadcast %cst_68 : f32 to vector<8x64xf32>
    %135 = arith.maximumf %133, %134 : vector<8x64xf32>
    %c1_69 = arith.constant 1 : index
    %c0_70 = arith.constant 0 : index
    %c0_71 = arith.constant 0 : index
    %136 = vector.load %arg14[%c1_69, %c0_70, %c0_71] : memref<2x64x32xbf16, #tpu.memory_space<vmem>>, vector<1x64x32xbf16>
    %137 = vector.shape_cast %136 : vector<1x64x32xbf16> to vector<64x32xbf16>
    %138 = arith.truncf %135 : vector<8x64xf32> to vector<8x64xbf16>
    %cst_72 = arith.constant dense<0.000000e+00> : vector<8x32xf32>
    %139 = tpu.matmul %138, %137, %cst_72 {dimension_numbers = #tpu.dot_dimension_numbers<[1], [0], [0], [1], [0, 0, 1, 1], [], []>} : vector<8x64xbf16>, vector<64x32xbf16>, vector<8x32xf32> -> vector<8x32xf32>
    %140 = arith.addf %116, %139 : vector<8x32xf32>
    %c0_73 = arith.constant 0 : index
    %c0_74 = arith.constant 0 : index
    %141 = vector.load %arg15[%c0_73, %c0_74] : memref<1x32xf32, #tpu.memory_space<vmem>>, vector<1x32xf32>
    %142 = arith.mulf %140, %140 : vector<8x32xf32>
    %cst_75 = arith.constant dense<0.000000e+00> : vector<8xf32>
    %143 = vector.multi_reduction <add>, %142, %cst_75 [1] : vector<8x32xf32> to vector<8xf32>
    %144 = vector.shape_cast %143 : vector<8xf32> to vector<8x1xf32>
    %cst_76 = arith.constant 3.200000e+01 : f32
    %145 = vector.broadcast %cst_76 : f32 to vector<8x1xf32>
    %146 = arith.divf %144, %145 : vector<8x1xf32>
    %cst_77 = arith.constant 9.99999997E-7 : f32
    %147 = vector.broadcast %cst_77 : f32 to vector<8x1xf32>
    %148 = arith.addf %146, %147 : vector<8x1xf32>
    %149 = math.rsqrt %148 : vector<8x1xf32>
    %150 = vector.broadcast %149 : vector<8x1xf32> to vector<8x32xf32>
    %151 = arith.mulf %140, %150 : vector<8x32xf32>
    %152 = vector.broadcast %141 : vector<1x32xf32> to vector<8x32xf32>
    %153 = arith.mulf %151, %152 : vector<8x32xf32>
    %c0_78 = arith.constant 0 : index
    %c0_79 = arith.constant 0 : index
    %154 = vector.load %arg2[%c0_78, %c0_79] : memref<8x32xf32, #tpu.memory_space<vmem>>, vector<8x32xf32>
    %c0_80 = arith.constant 0 : index
    %c0_81 = arith.constant 0 : index
    %155 = vector.load %arg16[%c0_80, %c0_81] : memref<2x32xf32, #tpu.memory_space<vmem>>, vector<1x32xf32>
    %156 = arith.mulf %154, %154 : vector<8x32xf32>
    %cst_82 = arith.constant dense<0.000000e+00> : vector<8xf32>
    %157 = vector.multi_reduction <add>, %156, %cst_82 [1] : vector<8x32xf32> to vector<8xf32>
    %158 = vector.shape_cast %157 : vector<8xf32> to vector<8x1xf32>
    %cst_83 = arith.constant 3.200000e+01 : f32
    %159 = vector.broadcast %cst_83 : f32 to vector<8x1xf32>
    %160 = arith.divf %158, %159 : vector<8x1xf32>
    %cst_84 = arith.constant 9.99999997E-7 : f32
    %161 = vector.broadcast %cst_84 : f32 to vector<8x1xf32>
    %162 = arith.addf %160, %161 : vector<8x1xf32>
    %163 = math.rsqrt %162 : vector<8x1xf32>
    %164 = vector.broadcast %163 : vector<8x1xf32> to vector<8x32xf32>
    %165 = arith.mulf %154, %164 : vector<8x32xf32>
    %166 = vector.broadcast %155 : vector<1x32xf32> to vector<8x32xf32>
    %167 = arith.mulf %165, %166 : vector<8x32xf32>
    %c0_85 = arith.constant 0 : index
    %c0_86 = arith.constant 0 : index
    %c0_87 = arith.constant 0 : index
    %168 = vector.load %arg17[%c0_85, %c0_86, %c0_87] : memref<2x32x96xbf16, #tpu.memory_space<vmem>>, vector<1x32x96xbf16>
    %169 = vector.shape_cast %168 : vector<1x32x96xbf16> to vector<32x96xbf16>
    %170 = arith.truncf %167 : vector<8x32xf32> to vector<8x32xbf16>
    %cst_88 = arith.constant dense<0.000000e+00> : vector<8x96xf32>
    %171 = tpu.matmul %170, %169, %cst_88 {dimension_numbers = #tpu.dot_dimension_numbers<[1], [0], [0], [1], [0, 0, 1, 1], [], []>} : vector<8x32xbf16>, vector<32x96xbf16>, vector<8x96xf32> -> vector<8x96xf32>
    %172 = vector.extract_strided_slice %171 {offsets = [0, 0], sizes = [8, 32], strides = [1, 1]} : vector<8x96xf32> to vector<8x32xf32>
    %173 = vector.extract_strided_slice %171 {offsets = [0, 32], sizes = [8, 32], strides = [1, 1]} : vector<8x96xf32> to vector<8x32xf32>
    %174 = vector.extract_strided_slice %171 {offsets = [0, 64], sizes = [8, 32], strides = [1, 1]} : vector<8x96xf32> to vector<8x32xf32>
    %c0_89 = arith.constant 0 : index
    %c0_90 = arith.constant 0 : index
    %c0_91 = arith.constant 0 : index
    %175 = vector.load %arg18[%c0_89, %c0_90, %c0_91] : memref<2x32x32xbf16, #tpu.memory_space<vmem>>, vector<1x32x32xbf16>
    %176 = vector.shape_cast %175 : vector<1x32x32xbf16> to vector<32x32xbf16>
    %177 = tpu.concatenate %173, %173, %173, %173 in 0 : vector<8x32xf32>, vector<8x32xf32>, vector<8x32xf32>, vector<8x32xf32> -> vector<32x32xf32>
    %178 = arith.mulf %177, %2 : vector<32x32xf32>
    %179 = tpu.concatenate %174, %174, %174, %174 in 0 : vector<8x32xf32>, vector<8x32xf32>, vector<8x32xf32>, vector<8x32xf32> -> vector<32x32xf32>
    %180 = arith.mulf %179, %2 : vector<32x32xf32>
    %181 = arith.truncf %172 : vector<8x32xf32> to vector<8x32xbf16>
    %182 = arith.truncf %178 : vector<32x32xf32> to vector<32x32xbf16>
    %cst_92 = arith.constant dense<0.000000e+00> : vector<8x32xf32>
    %183 = tpu.matmul %181, %182, %cst_92 {dimension_numbers = #tpu.dot_dimension_numbers<[1], [1], [0], [0], [0, 0, 1, 0], [], []>} : vector<8x32xbf16>, vector<32x32xbf16>, vector<8x32xf32> -> vector<8x32xf32>
    %184 = arith.addf %183, %5 : vector<8x32xf32>
    %cst_93 = arith.constant dense<0xFF800000> : vector<8xf32>
    %185 = vector.multi_reduction <maximumf>, %184, %cst_93 [1] : vector<8x32xf32> to vector<8xf32>
    %186 = vector.shape_cast %185 : vector<8xf32> to vector<8x1xf32>
    %187 = vector.broadcast %186 : vector<8x1xf32> to vector<8x32xf32>
    %188 = arith.subf %184, %187 : vector<8x32xf32>
    %189 = math.exp %188 : vector<8x32xf32>
    %cst_94 = arith.constant dense<0.000000e+00> : vector<8x32xf32>
    %190 = tpu.matmul %189, %3, %cst_94 {dimension_numbers = #tpu.dot_dimension_numbers<[1], [0], [0], [1], [0, 0, 1, 1], [], []>} : vector<8x32xf32>, vector<32x32xf32>, vector<8x32xf32> -> vector<8x32xf32>
    %191 = arith.divf %189, %190 : vector<8x32xf32>
    %192 = arith.truncf %191 : vector<8x32xf32> to vector<8x32xbf16>
    %193 = arith.truncf %180 : vector<32x32xf32> to vector<32x32xbf16>
    %cst_95 = arith.constant dense<0.000000e+00> : vector<8x32xf32>
    %194 = tpu.matmul %192, %193, %cst_95 {dimension_numbers = #tpu.dot_dimension_numbers<[1], [0], [0], [1], [0, 0, 1, 1], [], []>} : vector<8x32xbf16>, vector<32x32xbf16>, vector<8x32xf32> -> vector<8x32xf32>
    %195 = arith.truncf %194 : vector<8x32xf32> to vector<8x32xbf16>
    %cst_96 = arith.constant dense<0.000000e+00> : vector<8x32xf32>
    %196 = tpu.matmul %195, %176, %cst_96 {dimension_numbers = #tpu.dot_dimension_numbers<[1], [0], [0], [1], [0, 0, 1, 1], [], []>} : vector<8x32xbf16>, vector<32x32xbf16>, vector<8x32xf32> -> vector<8x32xf32>
    %197 = arith.addf %154, %196 : vector<8x32xf32>
    %c0_97 = arith.constant 0 : index
    %c0_98 = arith.constant 0 : index
    %198 = vector.load %arg19[%c0_97, %c0_98] : memref<2x32xf32, #tpu.memory_space<vmem>>, vector<1x32xf32>
    %199 = arith.mulf %197, %197 : vector<8x32xf32>
    %cst_99 = arith.constant dense<0.000000e+00> : vector<8xf32>
    %200 = vector.multi_reduction <add>, %199, %cst_99 [1] : vector<8x32xf32> to vector<8xf32>
    %201 = vector.shape_cast %200 : vector<8xf32> to vector<8x1xf32>
    %cst_100 = arith.constant 3.200000e+01 : f32
    %202 = vector.broadcast %cst_100 : f32 to vector<8x1xf32>
    %203 = arith.divf %201, %202 : vector<8x1xf32>
    %cst_101 = arith.constant 9.99999997E-7 : f32
    %204 = vector.broadcast %cst_101 : f32 to vector<8x1xf32>
    %205 = arith.addf %203, %204 : vector<8x1xf32>
    %206 = math.rsqrt %205 : vector<8x1xf32>
    %207 = vector.broadcast %206 : vector<8x1xf32> to vector<8x32xf32>
    %208 = arith.mulf %197, %207 : vector<8x32xf32>
    %209 = vector.broadcast %198 : vector<1x32xf32> to vector<8x32xf32>
    %210 = arith.mulf %208, %209 : vector<8x32xf32>
    %c0_102 = arith.constant 0 : index
    %c0_103 = arith.constant 0 : index
    %c0_104 = arith.constant 0 : index
    %211 = vector.load %arg20[%c0_102, %c0_103, %c0_104] : memref<2x32x32xbf16, #tpu.memory_space<vmem>>, vector<1x32x32xbf16>
    %212 = vector.shape_cast %211 : vector<1x32x32xbf16> to vector<32x32xbf16>
    %213 = arith.truncf %210 : vector<8x32xf32> to vector<8x32xbf16>
    %cst_105 = arith.constant dense<0.000000e+00> : vector<8x32xf32>
    %214 = tpu.matmul %213, %212, %cst_105 {dimension_numbers = #tpu.dot_dimension_numbers<[1], [0], [0], [1], [0, 0, 1, 1], [], []>} : vector<8x32xbf16>, vector<32x32xbf16>, vector<8x32xf32> -> vector<8x32xf32>
    %c0_106 = arith.constant 0 : index
    %c0_107 = arith.constant 0 : index
    %c0_108 = arith.constant 0 : index
    %215 = vector.load %arg21[%c0_106, %c0_107, %c0_108] : memref<2x32x64xbf16, #tpu.memory_space<vmem>>, vector<1x32x64xbf16>
    %216 = vector.shape_cast %215 : vector<1x32x64xbf16> to vector<32x64xbf16>
    %217 = arith.truncf %153 : vector<8x32xf32> to vector<8x32xbf16>
    %cst_109 = arith.constant dense<0.000000e+00> : vector<8x64xf32>
    %218 = tpu.matmul %217, %216, %cst_109 {dimension_numbers = #tpu.dot_dimension_numbers<[1], [0], [0], [1], [0, 0, 1, 1], [], []>} : vector<8x32xbf16>, vector<32x64xbf16>, vector<8x64xf32> -> vector<8x64xf32>
    %219 = vector.extract_strided_slice %218 {offsets = [0, 0], sizes = [8, 32], strides = [1, 1]} : vector<8x64xf32> to vector<8x32xf32>
    %220 = vector.extract_strided_slice %218 {offsets = [0, 32], sizes = [8, 32], strides = [1, 1]} : vector<8x64xf32> to vector<8x32xf32>
    %c0_110 = arith.constant 0 : index
    %c0_111 = arith.constant 0 : index
    %c0_112 = arith.constant 0 : index
    %221 = vector.load %arg22[%c0_110, %c0_111, %c0_112] : memref<2x32x32xbf16, #tpu.memory_space<vmem>>, vector<1x32x32xbf16>
    %222 = vector.shape_cast %221 : vector<1x32x32xbf16> to vector<32x32xbf16>
    %223 = tpu.concatenate %219, %219, %219, %219 in 0 : vector<8x32xf32>, vector<8x32xf32>, vector<8x32xf32>, vector<8x32xf32> -> vector<32x32xf32>
    %224 = arith.mulf %223, %0 : vector<32x32xf32>
    %225 = tpu.concatenate %220, %220, %220, %220 in 0 : vector<8x32xf32>, vector<8x32xf32>, vector<8x32xf32>, vector<8x32xf32> -> vector<32x32xf32>
    %226 = arith.mulf %225, %0 : vector<32x32xf32>
    %227 = arith.truncf %214 : vector<8x32xf32> to vector<8x32xbf16>
    %228 = arith.truncf %224 : vector<32x32xf32> to vector<32x32xbf16>
    %cst_113 = arith.constant dense<0.000000e+00> : vector<8x32xf32>
    %229 = tpu.matmul %227, %228, %cst_113 {dimension_numbers = #tpu.dot_dimension_numbers<[1], [1], [0], [0], [0, 0, 1, 0], [], []>} : vector<8x32xbf16>, vector<32x32xbf16>, vector<8x32xf32> -> vector<8x32xf32>
    %cst_114 = arith.constant dense<0xFF800000> : vector<8xf32>
    %230 = vector.multi_reduction <maximumf>, %229, %cst_114 [1] : vector<8x32xf32> to vector<8xf32>
    %231 = vector.shape_cast %230 : vector<8xf32> to vector<8x1xf32>
    %232 = vector.broadcast %231 : vector<8x1xf32> to vector<8x32xf32>
    %233 = arith.subf %229, %232 : vector<8x32xf32>
    %234 = math.exp %233 : vector<8x32xf32>
    %cst_115 = arith.constant dense<0.000000e+00> : vector<8x32xf32>
    %235 = tpu.matmul %234, %1, %cst_115 {dimension_numbers = #tpu.dot_dimension_numbers<[1], [0], [0], [1], [0, 0, 1, 1], [], []>} : vector<8x32xf32>, vector<32x32xf32>, vector<8x32xf32> -> vector<8x32xf32>
    %236 = arith.divf %234, %235 : vector<8x32xf32>
    %237 = arith.truncf %236 : vector<8x32xf32> to vector<8x32xbf16>
    %238 = arith.truncf %226 : vector<32x32xf32> to vector<32x32xbf16>
    %cst_116 = arith.constant dense<0.000000e+00> : vector<8x32xf32>
    %239 = tpu.matmul %237, %238, %cst_116 {dimension_numbers = #tpu.dot_dimension_numbers<[1], [0], [0], [1], [0, 0, 1, 1], [], []>} : vector<8x32xbf16>, vector<32x32xbf16>, vector<8x32xf32> -> vector<8x32xf32>
    %240 = arith.truncf %239 : vector<8x32xf32> to vector<8x32xbf16>
    %cst_117 = arith.constant dense<0.000000e+00> : vector<8x32xf32>
    %241 = tpu.matmul %240, %222, %cst_117 {dimension_numbers = #tpu.dot_dimension_numbers<[1], [0], [0], [1], [0, 0, 1, 1], [], []>} : vector<8x32xbf16>, vector<32x32xbf16>, vector<8x32xf32> -> vector<8x32xf32>
    %242 = arith.addf %197, %241 : vector<8x32xf32>
    %c0_118 = arith.constant 0 : index
    %c0_119 = arith.constant 0 : index
    %243 = vector.load %arg23[%c0_118, %c0_119] : memref<2x32xf32, #tpu.memory_space<vmem>>, vector<1x32xf32>
    %244 = arith.mulf %242, %242 : vector<8x32xf32>
    %cst_120 = arith.constant dense<0.000000e+00> : vector<8xf32>
    %245 = vector.multi_reduction <add>, %244, %cst_120 [1] : vector<8x32xf32> to vector<8xf32>
    %246 = vector.shape_cast %245 : vector<8xf32> to vector<8x1xf32>
    %cst_121 = arith.constant 3.200000e+01 : f32
    %247 = vector.broadcast %cst_121 : f32 to vector<8x1xf32>
    %248 = arith.divf %246, %247 : vector<8x1xf32>
    %cst_122 = arith.constant 9.99999997E-7 : f32
    %249 = vector.broadcast %cst_122 : f32 to vector<8x1xf32>
    %250 = arith.addf %248, %249 : vector<8x1xf32>
    %251 = math.rsqrt %250 : vector<8x1xf32>
    %252 = vector.broadcast %251 : vector<8x1xf32> to vector<8x32xf32>
    %253 = arith.mulf %242, %252 : vector<8x32xf32>
    %254 = vector.broadcast %243 : vector<1x32xf32> to vector<8x32xf32>
    %255 = arith.mulf %253, %254 : vector<8x32xf32>
    %c0_123 = arith.constant 0 : index
    %c0_124 = arith.constant 0 : index
    %c0_125 = arith.constant 0 : index
    %256 = vector.load %arg24[%c0_123, %c0_124, %c0_125] : memref<2x32x64xbf16, #tpu.memory_space<vmem>>, vector<1x32x64xbf16>
    %257 = vector.shape_cast %256 : vector<1x32x64xbf16> to vector<32x64xbf16>
    %258 = arith.truncf %255 : vector<8x32xf32> to vector<8x32xbf16>
    %cst_126 = arith.constant dense<0.000000e+00> : vector<8x64xf32>
    %259 = tpu.matmul %258, %257, %cst_126 {dimension_numbers = #tpu.dot_dimension_numbers<[1], [0], [0], [1], [0, 0, 1, 1], [], []>} : vector<8x32xbf16>, vector<32x64xbf16>, vector<8x64xf32> -> vector<8x64xf32>
    %cst_127 = arith.constant 0.000000e+00 : f32
    %260 = vector.broadcast %cst_127 : f32 to vector<8x64xf32>
    %261 = arith.maximumf %259, %260 : vector<8x64xf32>
    %c0_128 = arith.constant 0 : index
    %c0_129 = arith.constant 0 : index
    %c0_130 = arith.constant 0 : index
    %262 = vector.load %arg25[%c0_128, %c0_129, %c0_130] : memref<2x64x32xbf16, #tpu.memory_space<vmem>>, vector<1x64x32xbf16>
    %263 = vector.shape_cast %262 : vector<1x64x32xbf16> to vector<64x32xbf16>
    %264 = arith.truncf %261 : vector<8x64xf32> to vector<8x64xbf16>
    %cst_131 = arith.constant dense<0.000000e+00> : vector<8x32xf32>
    %265 = tpu.matmul %264, %263, %cst_131 {dimension_numbers = #tpu.dot_dimension_numbers<[1], [0], [0], [1], [0, 0, 1, 1], [], []>} : vector<8x64xbf16>, vector<64x32xbf16>, vector<8x32xf32> -> vector<8x32xf32>
    %266 = arith.addf %242, %265 : vector<8x32xf32>
    %c1_132 = arith.constant 1 : index
    %c0_133 = arith.constant 0 : index
    %267 = vector.load %arg16[%c1_132, %c0_133] : memref<2x32xf32, #tpu.memory_space<vmem>>, vector<1x32xf32>
    %268 = arith.mulf %266, %266 : vector<8x32xf32>
    %cst_134 = arith.constant dense<0.000000e+00> : vector<8xf32>
    %269 = vector.multi_reduction <add>, %268, %cst_134 [1] : vector<8x32xf32> to vector<8xf32>
    %270 = vector.shape_cast %269 : vector<8xf32> to vector<8x1xf32>
    %cst_135 = arith.constant 3.200000e+01 : f32
    %271 = vector.broadcast %cst_135 : f32 to vector<8x1xf32>
    %272 = arith.divf %270, %271 : vector<8x1xf32>
    %cst_136 = arith.constant 9.99999997E-7 : f32
    %273 = vector.broadcast %cst_136 : f32 to vector<8x1xf32>
    %274 = arith.addf %272, %273 : vector<8x1xf32>
    %275 = math.rsqrt %274 : vector<8x1xf32>
    %276 = vector.broadcast %275 : vector<8x1xf32> to vector<8x32xf32>
    %277 = arith.mulf %266, %276 : vector<8x32xf32>
    %278 = vector.broadcast %267 : vector<1x32xf32> to vector<8x32xf32>
    %279 = arith.mulf %277, %278 : vector<8x32xf32>
    %c1_137 = arith.constant 1 : index
    %c0_138 = arith.constant 0 : index
    %c0_139 = arith.constant 0 : index
    %280 = vector.load %arg17[%c1_137, %c0_138, %c0_139] : memref<2x32x96xbf16, #tpu.memory_space<vmem>>, vector<1x32x96xbf16>
    %281 = vector.shape_cast %280 : vector<1x32x96xbf16> to vector<32x96xbf16>
    %282 = arith.truncf %279 : vector<8x32xf32> to vector<8x32xbf16>
    %cst_140 = arith.constant dense<0.000000e+00> : vector<8x96xf32>
    %283 = tpu.matmul %282, %281, %cst_140 {dimension_numbers = #tpu.dot_dimension_numbers<[1], [0], [0], [1], [0, 0, 1, 1], [], []>} : vector<8x32xbf16>, vector<32x96xbf16>, vector<8x96xf32> -> vector<8x96xf32>
    %284 = vector.extract_strided_slice %283 {offsets = [0, 0], sizes = [8, 32], strides = [1, 1]} : vector<8x96xf32> to vector<8x32xf32>
    %285 = vector.extract_strided_slice %283 {offsets = [0, 32], sizes = [8, 32], strides = [1, 1]} : vector<8x96xf32> to vector<8x32xf32>
    %286 = vector.extract_strided_slice %283 {offsets = [0, 64], sizes = [8, 32], strides = [1, 1]} : vector<8x96xf32> to vector<8x32xf32>
    %c1_141 = arith.constant 1 : index
    %c0_142 = arith.constant 0 : index
    %c0_143 = arith.constant 0 : index
    %287 = vector.load %arg18[%c1_141, %c0_142, %c0_143] : memref<2x32x32xbf16, #tpu.memory_space<vmem>>, vector<1x32x32xbf16>
    %288 = vector.shape_cast %287 : vector<1x32x32xbf16> to vector<32x32xbf16>
    %289 = tpu.concatenate %285, %285, %285, %285 in 0 : vector<8x32xf32>, vector<8x32xf32>, vector<8x32xf32>, vector<8x32xf32> -> vector<32x32xf32>
    %290 = arith.mulf %289, %2 : vector<32x32xf32>
    %291 = tpu.concatenate %286, %286, %286, %286 in 0 : vector<8x32xf32>, vector<8x32xf32>, vector<8x32xf32>, vector<8x32xf32> -> vector<32x32xf32>
    %292 = arith.mulf %291, %2 : vector<32x32xf32>
    %293 = arith.truncf %284 : vector<8x32xf32> to vector<8x32xbf16>
    %294 = arith.truncf %290 : vector<32x32xf32> to vector<32x32xbf16>
    %cst_144 = arith.constant dense<0.000000e+00> : vector<8x32xf32>
    %295 = tpu.matmul %293, %294, %cst_144 {dimension_numbers = #tpu.dot_dimension_numbers<[1], [1], [0], [0], [0, 0, 1, 0], [], []>} : vector<8x32xbf16>, vector<32x32xbf16>, vector<8x32xf32> -> vector<8x32xf32>
    %296 = arith.addf %295, %5 : vector<8x32xf32>
    %cst_145 = arith.constant dense<0xFF800000> : vector<8xf32>
    %297 = vector.multi_reduction <maximumf>, %296, %cst_145 [1] : vector<8x32xf32> to vector<8xf32>
    %298 = vector.shape_cast %297 : vector<8xf32> to vector<8x1xf32>
    %299 = vector.broadcast %298 : vector<8x1xf32> to vector<8x32xf32>
    %300 = arith.subf %296, %299 : vector<8x32xf32>
    %301 = math.exp %300 : vector<8x32xf32>
    %cst_146 = arith.constant dense<0.000000e+00> : vector<8x32xf32>
    %302 = tpu.matmul %301, %3, %cst_146 {dimension_numbers = #tpu.dot_dimension_numbers<[1], [0], [0], [1], [0, 0, 1, 1], [], []>} : vector<8x32xf32>, vector<32x32xf32>, vector<8x32xf32> -> vector<8x32xf32>
    %303 = arith.divf %301, %302 : vector<8x32xf32>
    %304 = arith.truncf %303 : vector<8x32xf32> to vector<8x32xbf16>
    %305 = arith.truncf %292 : vector<32x32xf32> to vector<32x32xbf16>
    %cst_147 = arith.constant dense<0.000000e+00> : vector<8x32xf32>
    %306 = tpu.matmul %304, %305, %cst_147 {dimension_numbers = #tpu.dot_dimension_numbers<[1], [0], [0], [1], [0, 0, 1, 1], [], []>} : vector<8x32xbf16>, vector<32x32xbf16>, vector<8x32xf32> -> vector<8x32xf32>
    %307 = arith.truncf %306 : vector<8x32xf32> to vector<8x32xbf16>
    %cst_148 = arith.constant dense<0.000000e+00> : vector<8x32xf32>
    %308 = tpu.matmul %307, %288, %cst_148 {dimension_numbers = #tpu.dot_dimension_numbers<[1], [0], [0], [1], [0, 0, 1, 1], [], []>} : vector<8x32xbf16>, vector<32x32xbf16>, vector<8x32xf32> -> vector<8x32xf32>
    %309 = arith.addf %266, %308 : vector<8x32xf32>
    %c1_149 = arith.constant 1 : index
    %c0_150 = arith.constant 0 : index
    %310 = vector.load %arg19[%c1_149, %c0_150] : memref<2x32xf32, #tpu.memory_space<vmem>>, vector<1x32xf32>
    %311 = arith.mulf %309, %309 : vector<8x32xf32>
    %cst_151 = arith.constant dense<0.000000e+00> : vector<8xf32>
    %312 = vector.multi_reduction <add>, %311, %cst_151 [1] : vector<8x32xf32> to vector<8xf32>
    %313 = vector.shape_cast %312 : vector<8xf32> to vector<8x1xf32>
    %cst_152 = arith.constant 3.200000e+01 : f32
    %314 = vector.broadcast %cst_152 : f32 to vector<8x1xf32>
    %315 = arith.divf %313, %314 : vector<8x1xf32>
    %cst_153 = arith.constant 9.99999997E-7 : f32
    %316 = vector.broadcast %cst_153 : f32 to vector<8x1xf32>
    %317 = arith.addf %315, %316 : vector<8x1xf32>
    %318 = math.rsqrt %317 : vector<8x1xf32>
    %319 = vector.broadcast %318 : vector<8x1xf32> to vector<8x32xf32>
    %320 = arith.mulf %309, %319 : vector<8x32xf32>
    %321 = vector.broadcast %310 : vector<1x32xf32> to vector<8x32xf32>
    %322 = arith.mulf %320, %321 : vector<8x32xf32>
    %c1_154 = arith.constant 1 : index
    %c0_155 = arith.constant 0 : index
    %c0_156 = arith.constant 0 : index
    %323 = vector.load %arg20[%c1_154, %c0_155, %c0_156] : memref<2x32x32xbf16, #tpu.memory_space<vmem>>, vector<1x32x32xbf16>
    %324 = vector.shape_cast %323 : vector<1x32x32xbf16> to vector<32x32xbf16>
    %325 = arith.truncf %322 : vector<8x32xf32> to vector<8x32xbf16>
    %cst_157 = arith.constant dense<0.000000e+00> : vector<8x32xf32>
    %326 = tpu.matmul %325, %324, %cst_157 {dimension_numbers = #tpu.dot_dimension_numbers<[1], [0], [0], [1], [0, 0, 1, 1], [], []>} : vector<8x32xbf16>, vector<32x32xbf16>, vector<8x32xf32> -> vector<8x32xf32>
    %c1_158 = arith.constant 1 : index
    %c0_159 = arith.constant 0 : index
    %c0_160 = arith.constant 0 : index
    %327 = vector.load %arg21[%c1_158, %c0_159, %c0_160] : memref<2x32x64xbf16, #tpu.memory_space<vmem>>, vector<1x32x64xbf16>
    %328 = vector.shape_cast %327 : vector<1x32x64xbf16> to vector<32x64xbf16>
    %329 = arith.truncf %153 : vector<8x32xf32> to vector<8x32xbf16>
    %cst_161 = arith.constant dense<0.000000e+00> : vector<8x64xf32>
    %330 = tpu.matmul %329, %328, %cst_161 {dimension_numbers = #tpu.dot_dimension_numbers<[1], [0], [0], [1], [0, 0, 1, 1], [], []>} : vector<8x32xbf16>, vector<32x64xbf16>, vector<8x64xf32> -> vector<8x64xf32>
    %331 = vector.extract_strided_slice %330 {offsets = [0, 0], sizes = [8, 32], strides = [1, 1]} : vector<8x64xf32> to vector<8x32xf32>
    %332 = vector.extract_strided_slice %330 {offsets = [0, 32], sizes = [8, 32], strides = [1, 1]} : vector<8x64xf32> to vector<8x32xf32>
    %c1_162 = arith.constant 1 : index
    %c0_163 = arith.constant 0 : index
    %c0_164 = arith.constant 0 : index
    %333 = vector.load %arg22[%c1_162, %c0_163, %c0_164] : memref<2x32x32xbf16, #tpu.memory_space<vmem>>, vector<1x32x32xbf16>
    %334 = vector.shape_cast %333 : vector<1x32x32xbf16> to vector<32x32xbf16>
    %335 = tpu.concatenate %331, %331, %331, %331 in 0 : vector<8x32xf32>, vector<8x32xf32>, vector<8x32xf32>, vector<8x32xf32> -> vector<32x32xf32>
    %336 = arith.mulf %335, %0 : vector<32x32xf32>
    %337 = tpu.concatenate %332, %332, %332, %332 in 0 : vector<8x32xf32>, vector<8x32xf32>, vector<8x32xf32>, vector<8x32xf32> -> vector<32x32xf32>
    %338 = arith.mulf %337, %0 : vector<32x32xf32>
    %339 = arith.truncf %326 : vector<8x32xf32> to vector<8x32xbf16>
    %340 = arith.truncf %336 : vector<32x32xf32> to vector<32x32xbf16>
    %cst_165 = arith.constant dense<0.000000e+00> : vector<8x32xf32>
    %341 = tpu.matmul %339, %340, %cst_165 {dimension_numbers = #tpu.dot_dimension_numbers<[1], [1], [0], [0], [0, 0, 1, 0], [], []>} : vector<8x32xbf16>, vector<32x32xbf16>, vector<8x32xf32> -> vector<8x32xf32>
    %cst_166 = arith.constant dense<0xFF800000> : vector<8xf32>
    %342 = vector.multi_reduction <maximumf>, %341, %cst_166 [1] : vector<8x32xf32> to vector<8xf32>
    %343 = vector.shape_cast %342 : vector<8xf32> to vector<8x1xf32>
    %344 = vector.broadcast %343 : vector<8x1xf32> to vector<8x32xf32>
    %345 = arith.subf %341, %344 : vector<8x32xf32>
    %346 = math.exp %345 : vector<8x32xf32>
    %cst_167 = arith.constant dense<0.000000e+00> : vector<8x32xf32>
    %347 = tpu.matmul %346, %1, %cst_167 {dimension_numbers = #tpu.dot_dimension_numbers<[1], [0], [0], [1], [0, 0, 1, 1], [], []>} : vector<8x32xf32>, vector<32x32xf32>, vector<8x32xf32> -> vector<8x32xf32>
    %348 = arith.divf %346, %347 : vector<8x32xf32>
    %349 = arith.truncf %348 : vector<8x32xf32> to vector<8x32xbf16>
    %350 = arith.truncf %338 : vector<32x32xf32> to vector<32x32xbf16>
    %cst_168 = arith.constant dense<0.000000e+00> : vector<8x32xf32>
    %351 = tpu.matmul %349, %350, %cst_168 {dimension_numbers = #tpu.dot_dimension_numbers<[1], [0], [0], [1], [0, 0, 1, 1], [], []>} : vector<8x32xbf16>, vector<32x32xbf16>, vector<8x32xf32> -> vector<8x32xf32>
    %352 = arith.truncf %351 : vector<8x32xf32> to vector<8x32xbf16>
    %cst_169 = arith.constant dense<0.000000e+00> : vector<8x32xf32>
    %353 = tpu.matmul %352, %334, %cst_169 {dimension_numbers = #tpu.dot_dimension_numbers<[1], [0], [0], [1], [0, 0, 1, 1], [], []>} : vector<8x32xbf16>, vector<32x32xbf16>, vector<8x32xf32> -> vector<8x32xf32>
    %354 = arith.addf %309, %353 : vector<8x32xf32>
    %c1_170 = arith.constant 1 : index
    %c0_171 = arith.constant 0 : index
    %355 = vector.load %arg23[%c1_170, %c0_171] : memref<2x32xf32, #tpu.memory_space<vmem>>, vector<1x32xf32>
    %356 = arith.mulf %354, %354 : vector<8x32xf32>
    %cst_172 = arith.constant dense<0.000000e+00> : vector<8xf32>
    %357 = vector.multi_reduction <add>, %356, %cst_172 [1] : vector<8x32xf32> to vector<8xf32>
    %358 = vector.shape_cast %357 : vector<8xf32> to vector<8x1xf32>
    %cst_173 = arith.constant 3.200000e+01 : f32
    %359 = vector.broadcast %cst_173 : f32 to vector<8x1xf32>
    %360 = arith.divf %358, %359 : vector<8x1xf32>
    %cst_174 = arith.constant 9.99999997E-7 : f32
    %361 = vector.broadcast %cst_174 : f32 to vector<8x1xf32>
    %362 = arith.addf %360, %361 : vector<8x1xf32>
    %363 = math.rsqrt %362 : vector<8x1xf32>
    %364 = vector.broadcast %363 : vector<8x1xf32> to vector<8x32xf32>
    %365 = arith.mulf %354, %364 : vector<8x32xf32>
    %366 = vector.broadcast %355 : vector<1x32xf32> to vector<8x32xf32>
    %367 = arith.mulf %365, %366 : vector<8x32xf32>
    %c1_175 = arith.constant 1 : index
    %c0_176 = arith.constant 0 : index
    %c0_177 = arith.constant 0 : index
    %368 = vector.load %arg24[%c1_175, %c0_176, %c0_177] : memref<2x32x64xbf16, #tpu.memory_space<vmem>>, vector<1x32x64xbf16>
    %369 = vector.shape_cast %368 : vector<1x32x64xbf16> to vector<32x64xbf16>
    %370 = arith.truncf %367 : vector<8x32xf32> to vector<8x32xbf16>
    %cst_178 = arith.constant dense<0.000000e+00> : vector<8x64xf32>
    %371 = tpu.matmul %370, %369, %cst_178 {dimension_numbers = #tpu.dot_dimension_numbers<[1], [0], [0], [1], [0, 0, 1, 1], [], []>} : vector<8x32xbf16>, vector<32x64xbf16>, vector<8x64xf32> -> vector<8x64xf32>
    %cst_179 = arith.constant 0.000000e+00 : f32
    %372 = vector.broadcast %cst_179 : f32 to vector<8x64xf32>
    %373 = arith.maximumf %371, %372 : vector<8x64xf32>
    %c1_180 = arith.constant 1 : index
    %c0_181 = arith.constant 0 : index
    %c0_182 = arith.constant 0 : index
    %374 = vector.load %arg25[%c1_180, %c0_181, %c0_182] : memref<2x64x32xbf16, #tpu.memory_space<vmem>>, vector<1x64x32xbf16>
    %375 = vector.shape_cast %374 : vector<1x64x32xbf16> to vector<64x32xbf16>
    %376 = arith.truncf %373 : vector<8x64xf32> to vector<8x64xbf16>
    %cst_183 = arith.constant dense<0.000000e+00> : vector<8x32xf32>
    %377 = tpu.matmul %376, %375, %cst_183 {dimension_numbers = #tpu.dot_dimension_numbers<[1], [0], [0], [1], [0, 0, 1, 1], [], []>} : vector<8x64xbf16>, vector<64x32xbf16>, vector<8x32xf32> -> vector<8x32xf32>
    %378 = arith.addf %354, %377 : vector<8x32xf32>
    %c0_184 = arith.constant 0 : index
    %c0_185 = arith.constant 0 : index
    %379 = vector.load %arg26[%c0_184, %c0_185] : memref<1x32xf32, #tpu.memory_space<vmem>>, vector<1x32xf32>
    %380 = arith.mulf %378, %378 : vector<8x32xf32>
    %cst_186 = arith.constant dense<0.000000e+00> : vector<8xf32>
    %381 = vector.multi_reduction <add>, %380, %cst_186 [1] : vector<8x32xf32> to vector<8xf32>
    %382 = vector.shape_cast %381 : vector<8xf32> to vector<8x1xf32>
    %cst_187 = arith.constant 3.200000e+01 : f32
    %383 = vector.broadcast %cst_187 : f32 to vector<8x1xf32>
    %384 = arith.divf %382, %383 : vector<8x1xf32>
    %cst_188 = arith.constant 9.99999997E-7 : f32
    %385 = vector.broadcast %cst_188 : f32 to vector<8x1xf32>
    %386 = arith.addf %384, %385 : vector<8x1xf32>
    %387 = math.rsqrt %386 : vector<8x1xf32>
    %388 = vector.broadcast %387 : vector<8x1xf32> to vector<8x32xf32>
    %389 = arith.mulf %378, %388 : vector<8x32xf32>
    %390 = vector.broadcast %379 : vector<1x32xf32> to vector<8x32xf32>
    %391 = arith.mulf %389, %390 : vector<8x32xf32>
    %cst_189 = arith.constant 0.176776692 : f32
    %392 = vector.broadcast %cst_189 : f32 to vector<8x32xf32>
    %393 = arith.mulf %391, %392 : vector<8x32xf32>
    %394 = arith.truncf %393 : vector<8x32xf32> to vector<8x32xbf16>
    %c0_190 = arith.constant 0 : index
    %c0_191 = arith.constant 0 : index
    %395 = vector.load %arg27[%c0_190, %c0_191] : memref<128x32xbf16, #tpu.memory_space<vmem>>, vector<128x32xbf16>
    %cst_192 = arith.constant dense<0.000000e+00> : vector<8x128xf32>
    %396 = tpu.matmul %394, %395, %cst_192 {dimension_numbers = #tpu.dot_dimension_numbers<[1], [1], [0], [0], [0, 0, 1, 0], [], []>} : vector<8x32xbf16>, vector<128x32xbf16>, vector<8x128xf32> -> vector<8x128xf32>
    %c0_193 = arith.constant 0 : index
    %c0_194 = arith.constant 0 : index
    %397 = vector.load %arg28[%c0_193, %c0_194] : memref<8x128xf32, #tpu.memory_space<vmem>>, vector<8x128xf32>
    tpu.vector_store %arg28[%c0_193, %c0_194], %396 {strides = array<i32>} : memref<8x128xf32, #tpu.memory_space<vmem>>, vector<8x128xf32>,
    return
  }
  func.func @transform_0(%arg0: i32) -> (i32, i32) {
    %c0_i32 = arith.constant 0 : i32
    %c0_i32_0 = arith.constant 0 : i32
    return %arg0, %c0_i32 : i32, i32
  }
  func.func @transform_1(%arg0: i32) -> (i32, i32) {
    %c0_i32 = arith.constant 0 : i32
    %c0_i32_0 = arith.constant 0 : i32
    return %arg0, %c0_i32 : i32, i32
  }
  func.func @transform_2(%arg0: i32) -> (i32, i32) {
    %c0_i32 = arith.constant 0 : i32
    %c0_i32_0 = arith.constant 0 : i32
    %c0_i32_1 = arith.constant 0 : i32
    return %c0_i32, %c0_i32_0 : i32, i32
  }
  func.func @transform_3(%arg0: i32) -> (i32, i32) {
    %c0_i32 = arith.constant 0 : i32
    %c0_i32_0 = arith.constant 0 : i32
    %c0_i32_1 = arith.constant 0 : i32
    return %c0_i32, %c0_i32_0 : i32, i32
  }
  func.func @transform_4(%arg0: i32) -> (i32, i32) {
    %c0_i32 = arith.constant 0 : i32
    %c0_i32_0 = arith.constant 0 : i32
    %c0_i32_1 = arith.constant 0 : i32
    return %c0_i32, %c0_i32_0 : i32, i32
  }
  func.func @transform_5(%arg0: i32) -> (i32, i32) {
    %c0_i32 = arith.constant 0 : i32
    %c0_i32_0 = arith.constant 0 : i32
    %c0_i32_1 = arith.constant 0 : i32
    return %c0_i32, %c0_i32_0 : i32, i32
  }
  func.func @transform_6(%arg0: i32) -> (i32, i32) {
    %c0_i32 = arith.constant 0 : i32
    %c0_i32_0 = arith.constant 0 : i32
    %c0_i32_1 = arith.constant 0 : i32
    return %c0_i32, %c0_i32_0 : i32, i32
  }
  func.func @transform_7(%arg0: i32) -> (i32, i32) {
    %c0_i32 = arith.constant 0 : i32
    %c0_i32_0 = arith.constant 0 : i32
    %c0_i32_1 = arith.constant 0 : i32
    return %c0_i32, %c0_i32_0 : i32, i32
  }
  func.func @transform_8(%arg0: i32) -> (i32, i32) {
    %c0_i32 = arith.constant 0 : i32
    %c0_i32_0 = arith.constant 0 : i32
    %c0_i32_1 = arith.constant 0 : i32
    return %c0_i32, %c0_i32_0 : i32, i32
  }
  func.func @transform_9(%arg0: i32) -> (i32, i32, i32) {
    %c0_i32 = arith.constant 0 : i32
    %c0_i32_0 = arith.constant 0 : i32
    %c0_i32_1 = arith.constant 0 : i32
    %c0_i32_2 = arith.constant 0 : i32
    return %c0_i32, %c0_i32_0, %c0_i32_1 : i32, i32, i32
  }
  func.func @transform_10(%arg0: i32) -> (i32, i32, i32) {
    %c0_i32 = arith.constant 0 : i32
    %c0_i32_0 = arith.constant 0 : i32
    %c0_i32_1 = arith.constant 0 : i32
    %c0_i32_2 = arith.constant 0 : i32
    return %c0_i32, %c0_i32_0, %c0_i32_1 : i32, i32, i32
  }
  func.func @transform_11(%arg0: i32) -> (i32, i32) {
    %c0_i32 = arith.constant 0 : i32
    %c0_i32_0 = arith.constant 0 : i32
    %c0_i32_1 = arith.constant 0 : i32
    return %c0_i32, %c0_i32_0 : i32, i32
  }
  func.func @transform_12(%arg0: i32) -> (i32, i32, i32) {
    %c0_i32 = arith.constant 0 : i32
    %c0_i32_0 = arith.constant 0 : i32
    %c0_i32_1 = arith.constant 0 : i32
    %c0_i32_2 = arith.constant 0 : i32
    return %c0_i32, %c0_i32_0, %c0_i32_1 : i32, i32, i32
  }
  func.func @transform_13(%arg0: i32) -> (i32, i32, i32) {
    %c0_i32 = arith.constant 0 : i32
    %c0_i32_0 = arith.constant 0 : i32
    %c0_i32_1 = arith.constant 0 : i32
    %c0_i32_2 = arith.constant 0 : i32
    return %c0_i32, %c0_i32_0, %c0_i32_1 : i32, i32, i32
  }
  func.func @transform_14(%arg0: i32) -> (i32, i32) {
    %c0_i32 = arith.constant 0 : i32
    %c0_i32_0 = arith.constant 0 : i32
    %c0_i32_1 = arith.constant 0 : i32
    return %c0_i32, %c0_i32_0 : i32, i32
  }
  func.func @transform_15(%arg0: i32) -> (i32, i32) {
    %c0_i32 = arith.constant 0 : i32
    %c0_i32_0 = arith.constant 0 : i32
    %c0_i32_1 = arith.constant 0 : i32
    return %c0_i32, %c0_i32_0 : i32, i32
  }
  func.func @transform_16(%arg0: i32) -> (i32, i32, i32) {
    %c0_i32 = arith.constant 0 : i32
    %c0_i32_0 = arith.constant 0 : i32
    %c0_i32_1 = arith.constant 0 : i32
    %c0_i32_2 = arith.constant 0 : i32
    return %c0_i32, %c0_i32_0, %c0_i32_1 : i32, i32, i32
  }
  func.func @transform_17(%arg0: i32) -> (i32, i32, i32) {
    %c0_i32 = arith.constant 0 : i32
    %c0_i32_0 = arith.constant 0 : i32
    %c0_i32_1 = arith.constant 0 : i32
    %c0_i32_2 = arith.constant 0 : i32
    return %c0_i32, %c0_i32_0, %c0_i32_1 : i32, i32, i32
  }
  func.func @transform_18(%arg0: i32) -> (i32, i32) {
    %c0_i32 = arith.constant 0 : i32
    %c0_i32_0 = arith.constant 0 : i32
    %c0_i32_1 = arith.constant 0 : i32
    return %c0_i32, %c0_i32_0 : i32, i32
  }
  func.func @transform_19(%arg0: i32) -> (i32, i32, i32) {
    %c0_i32 = arith.constant 0 : i32
    %c0_i32_0 = arith.constant 0 : i32
    %c0_i32_1 = arith.constant 0 : i32
    %c0_i32_2 = arith.constant 0 : i32
    return %c0_i32, %c0_i32_0, %c0_i32_1 : i32, i32, i32
  }
  func.func @transform_20(%arg0: i32) -> (i32, i32, i32) {
    %c0_i32 = arith.constant 0 : i32
    %c0_i32_0 = arith.constant 0 : i32
    %c0_i32_1 = arith.constant 0 : i32
    %c0_i32_2 = arith.constant 0 : i32
    return %c0_i32, %c0_i32_0, %c0_i32_1 : i32, i32, i32
  }
  func.func @transform_21(%arg0: i32) -> (i32, i32, i32) {
    %c0_i32 = arith.constant 0 : i32
    %c0_i32_0 = arith.constant 0 : i32
    %c0_i32_1 = arith.constant 0 : i32
    %c0_i32_2 = arith.constant 0 : i32
    return %c0_i32, %c0_i32_0, %c0_i32_1 : i32, i32, i32
  }
  func.func @transform_22(%arg0: i32) -> (i32, i32) {
    %c0_i32 = arith.constant 0 : i32
    %c0_i32_0 = arith.constant 0 : i32
    %c0_i32_1 = arith.constant 0 : i32
    return %c0_i32, %c0_i32_0 : i32, i32
  }
  func.func @transform_23(%arg0: i32) -> (i32, i32, i32) {
    %c0_i32 = arith.constant 0 : i32
    %c0_i32_0 = arith.constant 0 : i32
    %c0_i32_1 = arith.constant 0 : i32
    %c0_i32_2 = arith.constant 0 : i32
    return %c0_i32, %c0_i32_0, %c0_i32_1 : i32, i32, i32
  }
  func.func @transform_24(%arg0: i32) -> (i32, i32, i32) {
    %c0_i32 = arith.constant 0 : i32
    %c0_i32_0 = arith.constant 0 : i32
    %c0_i32_1 = arith.constant 0 : i32
    %c0_i32_2 = arith.constant 0 : i32
    return %c0_i32, %c0_i32_0, %c0_i32_1 : i32, i32, i32
  }
  func.func @transform_25(%arg0: i32) -> (i32, i32) {
    %c0_i32 = arith.constant 0 : i32
    %c0_i32_0 = arith.constant 0 : i32
    %c0_i32_1 = arith.constant 0 : i32
    return %c0_i32, %c0_i32_0 : i32, i32
  }
  func.func @transform_26(%arg0: i32) -> (i32, i32) {
    %c0_i32 = arith.constant 0 : i32
    %c0_i32_0 = arith.constant 0 : i32
    %c0_i32_1 = arith.constant 0 : i32
    return %c0_i32, %c0_i32_0 : i32, i32
  }
  func.func @transform_27(%arg0: i32) -> (i32, i32) {
    %c0_i32 = arith.constant 0 : i32
    %c0_i32_0 = arith.constant 0 : i32
    return %arg0, %c0_i32 : i32, i32
  }
}

</mosaic_0001>

<bundles_post_ra>
// kernel: t5_forward.1
= control target key start
LH: loop header
LB: loop body
LE: loop exit
PB: predicated region body
PF: predicated region fallthrough
CT: control target
= control target key end

     0   :  { %s5659_s0 = inlined_call_operand.vmem [shape: f32[16,32], index: 0, kind: input, shape index: {}]   ;;  %s5660_s1 = inlined_call_operand.vmem [shape: f32[16,32], index: 1, kind: input, shape index: {}]   ;;  %s5661_s2 = inlined_call_operand.vmem [shape: f32[8,32], index: 2, kind: input, shape index: {}]   ;;  %s5662_s3 = inlined_call_operand.vmem [shape: f32[8,32], index: 3, kind: input, shape index: {}]   ;;  %s5663_s4 = inlined_call_operand.vmem [shape: f32[32,32], index: 4, kind: input, shape index: {}, may-alias: {4,5,6,7}]   ;;  %s5664_s5 = inlined_call_operand.vmem [shape: f32[32,32], index: 5, kind: input, shape index: {}, may-alias: {4,5,6,7}]   ;;  %s5665_s6 = inlined_call_operand.vmem [shape: f32[32,32], index: 6, kind: input, shape index: {}, may-alias: {4,5,6,7}]   ;;  %s5666_s7 = inlined_call_operand.vmem [shape: f32[32,32], index: 7, kind: input, shape index: {}, may-alias: {4,5,6,7}]   ;;  %s5667_s8 = inlined_call_operand.vmem [shape: f32[2,32], index: 8, kind: input, shape index: {}]   ;;  %s5668_s9 = inlined_call_operand.vmem [shape: bf16[2,32,96], index: 9, kind: input, shape index: {}]   ;;  %s5669_s10 = inlined_call_operand.vmem [shape: bf16[2,32,32], index: 10, kind: input, shape index: {}]   ;;  %s5670_s11 = inlined_call_operand.vmem [shape: f32[2,32], index: 11, kind: input, shape index: {}]   ;;  %s5671_s12 = inlined_call_operand.vmem [shape: bf16[2,32,64], index: 12, kind: input, shape index: {}]   ;;  %s5672_s13 = inlined_call_operand.vmem [shape: bf16[2,64,32], index: 13, kind: input, shape index: {}]   ;;  %s5673_s14 = inlined_call_operand.vmem [shape: f32[1,32], index: 14, kind: input, shape index: {}]   ;;  %s5674_s15 = inlined_call_operand.vmem [shape: f32[2,32], index: 15, kind: input, shape index: {}]   ;;  %s5675_s16 = inlined_call_operand.vmem [shape: bf16[2,32,96], index: 16, kind: input, shape index: {}]   ;;  %s5676_s17 = inlined_call_operand.vmem [shape: bf16[2,32,32], index: 17, kind: input, shape index: {}]   ;;  %s5677_s18 = inlined_call_operand.vmem [shape: f32[2,32], index: 18, kind: input, shape index: {}]   ;;  %s5678_s19 = inlined_call_operand.vmem [shape: bf16[2,32,32], index: 19, kind: input, shape index: {}]   ;;  %s5679_s20 = inlined_call_operand.vmem [shape: bf16[2,32,64], index: 20, kind: input, shape index: {}]   ;;  %s5680_s21 = inlined_call_operand.vmem [shape: bf16[2,32,32], index: 21, kind: input, shape index: {}]   ;;  %s5681_s22 = inlined_call_operand.vmem [shape: f32[2,32], index: 22, kind: input, shape index: {}]   ;;  %s5682_s23 = inlined_call_operand.vmem [shape: bf16[2,32,64], index: 23, kind: input, shape index: {}]   ;;  %s5683_s24 = inlined_call_operand.vmem [shape: bf16[2,64,32], index: 24, kind: input, shape index: {}]   ;;  %s5684_s25 = inlined_call_operand.vmem [shape: f32[1,32], index: 25, kind: input, shape index: {}]   ;;  %s5685_s26 = inlined_call_operand.vmem [shape: bf16[128,32], index: 26, kind: input, shape index: {}]   ;;  %s5686_s27 = inlined_call_operand.vmem [shape: f32[16,128], index: 27, kind: output, shape index: {}]  }
   0x1   :  { %5706 = sst [smem:[#allocation3_spill]] %s5659_s0 }
   0x2   :  { %5707 = sst [smem:[#allocation4_spill]] %s5660_s1 }
   0x3   :  { %5708 = sst [smem:[#allocation5_spill]] %s5661_s2 }
   0x4   :  { %5709 = sst [smem:[#allocation6_spill]] %s5662_s3 }
   0x5   :  { %5710 = sst [smem:[#allocation7_spill]] %s5663_s4 }
   0x6   :  { %5711 = sst [smem:[#allocation8_spill]] %s5664_s5 }
   0x7   :  { %5712 = sst [smem:[#allocation9_spill]] %s5665_s6 }
   0x8   :  { %5713 = sst [smem:[#allocation10_spill]] %s5666_s7  ;;  %s4887_s7 = smov 0  }
   0x9   :  { %5714 = sst [smem:[#allocation11_spill]] %s5667_s8 }
   0xa   :  { %5715 = sst [smem:[#allocation12_spill]] %s5668_s9 }
   0xb   :  { %5716 = sst [smem:[#allocation13_spill]] %s5669_s10 }
   0xc   :  { %5717 = sst [smem:[#allocation14_spill]] %s5670_s11 }
   0xd   :  { %5718 = sst [smem:[#allocation15_spill]] %s5671_s12 }
   0xe LB: > { %5719 = sst [smem:[#allocation2_spill]] %s4739_s7  ;;  %s3873_s4 = sadd.s32 4294967295, %s4739_s7   ;;  %s4739_s7 = sphi %s4887_s7, %s37_s7  }
   0xf   : > { %p3877_p0 = scmp.ge.s32.totalorder %s4739_s7, 1  ;;  %p745_p1 = scmp.lt.s32.totalorder %s4739_s7, 3 }
  0x11   : > { %p746_p2 = pnand %p3877_p0, %p745_p1 }
  0x12   : > { %p819_p3 = scmp.lt.s32.totalorder (!%p746_p2), %s3873_s4, 1  ;;  %s5720_s5 = sld [smem:[#allocation3_spill]] (!%p746_p2)  ;;  %vm853_vm0 = vcmask (!%p746_p2), 261120   ;;  %v4741_v5 = vmov (!%p746_p2), 0.0   ;;  %vm4742_vm1 = vmmov (!%p746_p2), 0   ;;  %v4746_v57 = vmov (!%p746_p2), 0.0|0.0  }
  0x13   : > { %749 = sbr.rel (%p746_p2) target bundleno = 11179 (0x2bab), region = 128  ;;  %s5721_s29 = sld [smem:[#allocation12_spill]] (!%p746_p2)  ;;  %4197 = vmatprep.subr.bf16.mxu0 (!%p746_p2), %v4741_v5  ;;  %4201 = vmatprep.mubr.msk.bf16.mxu0 (!%p746_p2), %vm4742_vm1, %v4741_v5  ;;  %vm1325_vm2 = vcmask (!%p746_p2), 523264  }
  0x14   : > { %4248 = vmatprep.subr.bf16.mxu1 (!%p746_p2), %v4741_v5  ;;  %4256 = vmatprep.mubr.msk.bf16.mxu1 (!%p746_p2), %vm4742_vm1, %v4741_v5  ;;  %s5722_s3 = sld [smem:[#allocation7_spill]] (!%p746_p2)  ;;  %s5695_s9 = smov (!%p746_p2), 32  }
  0x15   : > { %s5697_s0 = smov (!%p746_p2), 64   ;;  %s5723_s2 = sld [smem:[#allocation11_spill]] (!%p746_p2) }
  0x16   : > { %s5725_s6 = sld [smem:[#allocation8_spill]] (!%p746_p2)  ;;  %s5726_s10 = sld [smem:[#allocation13_spill]] (!%p746_p2) }
  0x17   : > { %s5727_s12 = sld [smem:[#allocation15_spill]] (!%p746_p2)  ;;  %s5729_s1 = smov (!%p746_p2), 96  }
  0x18   : > { %s5730_s11 = smov (!%p746_p2), 64  }
  0x19   : > { %v4621_v3 = vld [vmem:[%s5721_s29] sm:$0xff] (!%p746_p2)   ;;  %v4622_v4 = vld [vmem:[%s5721_s29 + $0x8] sm:$0xff] (!%p746_p2)  }
  0x1a   : > { %s5738_s4 = smov (!%p819_p3, %s3873_s4), 1  ;;  %4198 = vmatpush3.bf16.msra.mxu0 %v4621_v3  ;;  %v4923_v6 = vld [vmem:[%s5722_s3] sm:$0xff]  ;;  %v4928_v7 = vld [vmem:[%s5722_s3 + $0x8] sm:$0xff]  ;;  %v4937_v8 = vld [vmem:[%s5722_s3 + $0x10] sm:$0xff] }
  0x1b   : > { %s4895_s8 = sshll.u32 %s5738_s4, 3  ;;  %4199 = vmatprep.subr.bf16.mxu0 %v4741_v5  ;;  %937 = vrot.lane.b32.xlu1 %v4928_v7, %s5695_s9  ;;  %v4946_v9 = vld [vmem:[%s5722_s3 + $0x18] sm:$0xff]  ;;  %v3881_v14 = vld [vmem:[%s5723_s2] ss:$0 sm:$0xff]  ;;  %s5699_s4 = smov 96  }
  0x1c   : > { %s822_s28 = scalar_lea.vmem %s5720_s5, %s4895_s8  ;;  %v836_v54 = vld [vmem:[%s5725_s6] sm:$0xff]  ;;  %v837_v55 = vld [vmem:[%s5725_s6 + $0x8] sm:$0xff]  ;;  %v838_v56 = vld [vmem:[%s5725_s6 + $0x10] sm:$0xff]  ;;  %s5731_s5 = sld [smem:[#allocation4_spill]] }
  0x1d   : > { %v4901_v0 = vld [vmem:[%s822_s28] sm:$0xff]  ;;  %s5724_s28 = sld [smem:[#allocation5_spill]]  ;;  %v5014_v58 = vpack.c.bf16 %v837_v55, %v836_v54  ;;  %v839_v59 = vld [vmem:[%s5725_s6 + $0x18] sm:$0xff]  ;;  %s5732_s6 = sld [smem:[#allocation9_spill]] }
  0x1e   : > { %v852_v1 = vmul.f32 %v4901_v0, %v4901_v0  ;;  %4200 = vmatpush3.bf16.msra.mxu0 %v4622_v4  ;;  %v5020_v60 = vpack.c.bf16 %v839_v59, %v838_v56 }
  0x1f   : > { %4205 = vmatprep.subr.bf16.mxu0 %v4741_v5  ;;  %939 = vrot.lane.b32.xlu1 %v4937_v8, %s5695_s9 }
  0x20   : > { %v854_v2 = vsel %vm853_vm0, %v852_v1, 0.0 }
  0x21   : > { %855 = vadd.xlane.f32.xlu0 %v854_v2 }
  0x23   : > { %941 = vrot.lane.b32.xlu1 %v4946_v9, %s5695_s9  ;;  %v5000_v47 = vld [vmem:[%s5724_s28] sm:$0xff]  ;;  %s826_s28 = scalar_lea.vmem %s5731_s5, %s4895_s8 }
  0x37   : > { %935 = vrot.lane.b32.xlu0 %v4923_v6, %s5695_s9  ;;  %s5728_s9 = sld [smem:[#allocation14_spill]] }
  0x3b   : > { %951 = vrot.lane.b32.xlu0 %v4923_v6, %s5697_s0 }
  0x3f   : > { %953 = vrot.lane.b32.xlu0 %v4928_v7, %s5697_s0 }
  0x43   : > { %955 = vrot.lane.b32.xlu0 %v4937_v8, %s5697_s0 }
  0x47   : > { %957 = vrot.lane.b32.xlu0 %v4946_v9, %s5697_s0 }
  0x8d   : > { %v4967_v20 = vpop.permute.xlu1 %937 }
  0x91   : > { %v4971_v22 = vpop.permute.xlu1 %939 }
  0x95   : > { %v4975_v24 = vpop.permute.xlu1 %941 }
  0xae   : > { %v856_v10 = vpop.xlane.xlu0 %855 }
  0xaf   : > { %v858_v11 = vmul.f32 0.03125, %v856_v10 }
  0xb1   : > { %v859_v12 = vadd.f32 1e-06, %v858_v11 }
  0xb2   : > { %v4963_v18 = vpop.permute.xlu0 %935 }
  0xb3   : > { %4681 = vrsqrt.f32 %v859_v12 }
  0xb6   : > { %v4965_v19 = vpop.permute.xlu0 %951 }
  0xba   : > { %v4969_v21 = vpop.permute.xlu0 %953 }
  0xbd   : > { %v4682_v13 = vpop.eup %4681 }
  0xbe   : > { %v861_v15 = vmul.f32 %v4682_v13, %v4901_v0  ;;  %v4973_v23 = vpop.permute.xlu0 %955  ;;  %v4623_v13 = vld [vmem:[%s5726_s10] sm:$0xff]  }
  0xc0   : > { %v866_v16 = vmul.f32 %v3881_v14, %v861_v15  ;;  %v4624_v15 = vld [vmem:[%s5726_s10 + $0x8] sm:$0xff]  }
  0xc2   : > { %v871_v17 = vpack.c.bf16 %v866_v16, %v866_v16  ;;  %v4977_v26 = vpop.permute.xlu0 %957 }
  0xc4   : > { %4202 = vmatmul.mubr.msk.bf16.vlgmr.msra.gmra.mrb[0].mxu0 %vm853_vm0, %v871_v17 }
  0xc5   : > { %4209 = vmatprep.mubr.msk.bf16.mxu0 %vm4742_vm1, %v4741_v5 }
 0x197   : > { %v921_v25 = vpop.f32.mrb[0].mxu0 }
 0x198   : > { %v4203_v27 = vpop.f32.mrb[1].mxu0  ;;  %v947_v28 = vmul.f32 %v4963_v18, %v921_v25  ;;  %v948_v29 = vmul.f32 %v4967_v20, %v921_v25  ;;  %v963_v31 = vmul.f32 %v4965_v19, %v921_v25  ;;  %v964_v32 = vmul.f32 %v4969_v21, %v921_v25 }
 0x199   : > { %v924_v30 = vpop.f32.mrb[2].mxu0  ;;  %v949_v35 = vmul.f32 %v4971_v22, %v921_v25  ;;  %v950_v36 = vmul.f32 %v4975_v24, %v921_v25  ;;  %v965_v37 = vmul.f32 %v4973_v23, %v921_v25  ;;  %v966_v38 = vmul.f32 %v4977_v26, %v921_v25 }
 0x19a   : > { %v4204_v33 = vpop.f32.mrb[3].mxu0  ;;  %v968_v34 = vpack.c.bf16 %v948_v29, %v947_v28  ;;  %v1107_v39 = vpack.c.bf16 %v964_v32, %v963_v31  ;;  %v967_v46 = vpack.c.bf16 %v921_v25, %v921_v25 }
 0x19b   : > { %v969_v40 = vpack.c.bf16 %v950_v36, %v949_v35  ;;  %v1108_v41 = vpack.c.bf16 %v966_v38, %v965_v37  ;;  %v4625_v36 = vld [vmem:[%s5727_s12] sm:$0xff]   ;;  %v4626_v37 = vld [vmem:[%s5727_s12 + $0x8] sm:$0xff]  }
 0x19c   : > { %972 = vrot.lane.b32.xlu1 %v968_v34, %s5699_s4  ;;  %1111 = vrot.lane.b32.xlu0 %v1107_v39, %s5697_s0  ;;  %v4628_v38 = vld [vmem:[%s5672_s13 + $0x8] sm:$0xff]   ;;  %v4629_v39 = vld [vmem:[%s5672_s13 + $0x10] sm:$0xff]  }
 0x1a0   : > { %974 = vrot.lane.b32.xlu1 %v969_v40, %s5699_s4  ;;  %1113 = vrot.lane.b32.xlu0 %v1108_v41, %s5697_s0  ;;  %s5733_s4 = smov 32  }
 0x20e   : > { %v973_v42 = vpop.permute.xlu1 %972  ;;  %v1112_v1 = vpop.permute.xlu0 %1111 }
 0x20f   : > { %v980_v43 = vsel %vm853_vm0, %v973_v42, 0 }
 0x210   : > { %4206 = vmatpush3.bf16.xpose.msra.mxu0 %v980_v43 }
 0x211   : > { %4207 = vmatprep.subr.bf16.mxu0 %v4741_v5 }
 0x212   : > { %v975_v44 = vpop.permute.xlu1 %974  ;;  %v1114_v3 = vpop.permute.xlu0 %1113 }
 0x213   : > { %v983_v45 = vsel %vm853_vm0, %v975_v44, 0  ;;  %v3891_v44 = vld [vmem:[%s5728_s9] ss:$0 sm:$0xff] }
 0x218   : > { %4208 = vmatpush3.bf16.xpose.msra.mxu0 %v983_v45 }
 0x219   : > { %4571 = vmatprep.subr.bf16.mxu0 %v4746_v57 }
 0x21f   : > { %4210 = vmatmul.mubr.msk.bf16.vlgmr.msra.gmra.mrb[4].mxu0 %vm853_vm0, %v967_v46 }
 0x220   : > { %4221 = vmatprep.mubr.msk.f32.mxu0 %vm4742_vm1, %v4741_v5  ;;  %4573 = vmatpush3.bf16.msra.mxu0 %v5014_v58 }
 0x221   : > { %4574 = vmatprep.subr.bf16.mxu0 %v4746_v57 }
 0x224   : > { %4576 = vmatpush3.bf16.msra.mxu0 %v5020_v60 }
 0x225   : > { %4224 = vmatprep.subr.bf16.mxu0 %v4741_v5 }
 0x2f2   : > { %v1019_v48 = vpop.f32.mrb[4].mxu0 }
 0x2f3   : > { %v1020_v49 = vadd.f32 %v1019_v48, %v5000_v47  ;;  %v4211_v50 = vpop.f32.mrb[5].mxu0 }
 0x2f4   : > { %v1022_v51 = vpop.f32.mrb[6].mxu0 }
 0x2f5   : > { %v4212_v52 = vpop.f32.mrb[7].mxu0  ;;  %v1025_v53 = vsel %vm853_vm0, %v1020_v49, -inf }
 0x2f6   : > { %1026 = vmax.xlane.f32.xlu1 %v1025_v53 }
 0x383   : > { %v1027_v61 = vpop.xlane.xlu1 %1026 }
 0x384   : > { %v1028_v62 = vsub.f32 %v1020_v49, %v1027_v61  ;;  %v4630_v49 = vld [vmem:[%s5672_s13 + $0x18] sm:$0xff]  }
 0x386   : > { %v1029_v63 = vmul.f32 1.442695, %v1028_v62 }
 0x388   : > { %4683 = vpow2.f32 %v1029_v63 }
 0x392   : > { %v4684_v2 = vpop.eup %4683 }
 0x393   : > { %4222 = vmatmul.mubr.msk.f32.vlgmr.msra.gmra.mrb[8].mxu0 %vm853_vm0, %v4684_v2 }
 0x394   : > { %4225 = vmatpush3.bf16.msra.mxu0 %v1112_v1  ;;  %4228 = vmatprep.mubr.msk.bf16.mxu0 %vm4742_vm1, %v4741_v5 }
 0x395   : > { %4226 = vmatprep.subr.bf16.mxu0 %v4741_v5 }
 0x398   : > { %4227 = vmatpush3.bf16.msra.mxu0 %v1114_v3  ;;  %v4631_v3 = vld [vmem:[%s5721_s29 + $0x10] sm:$0xff]  }
 0x399   : > { %4232 = vmatprep.subr.bf16.mxu0 %v4741_v5 }
 0x466   : > { %v1100_v4 = vpop.f32.mrb[8].mxu0 }
 0x467   : > { %4685 = vrcp.f32 %v1100_v4  ;;  %v4223_v10 = vpop.f32.mrb[9].mxu0  ;;  %v4632_v4 = vld [vmem:[%s5721_s29 + $0x18] sm:$0xff]  }
 0x471   : > { %v4686_v11 = vpop.eup %4685 }
 0x472   : > { %v1105_v12 = vmul.f32 %v4686_v11, %v4684_v2 }
 0x474   : > { %v1106_v14 = vpack.c.bf16 %v1105_v12, %v1105_v12 }
 0x476   : > { %4229 = vmatmul.mubr.msk.bf16.vlgmr.msra.gmra.mrb[12].mxu0 %vm853_vm0, %v1106_v14  ;;  %v3900_v14 = vld [vmem:[%s5723_s2 + $0x1] ss:$0 sm:$0xff]  ;;  %s5735_s2 = sld [smem:[#allocation10_spill]] }
 0x477   : > { %4233 = vmatpush3.bf16.msra.mxu0 %v4623_v13  ;;  %4236 = vmatprep.mubr.msk.bf16.mxu0 %vm4742_vm1, %v4741_v5 }
 0x478   : > { %4234 = vmatprep.subr.bf16.mxu0 %v4741_v5 }
 0x47b   : > { %4235 = vmatpush3.bf16.msra.mxu0 %v4624_v15 }
 0x47c   : > { %4240 = vmatprep.subr.bf16.mxu0 %v4741_v5 }
 0x549   : > { %v1154_v16 = vpop.f32.mrb[12].mxu0 }
 0x54a   : > { %v1160_v17 = vpack.c.bf16 %v1154_v16, %v1154_v16  ;;  %v4230_v25 = vpop.f32.mrb[13].mxu0 }
 0x54b   : > { %v1157_v27 = vpop.f32.mrb[14].mxu0 }
 0x54c   : > { %v4231_v28 = vpop.f32.mrb[15].mxu0  ;;  %4237 = vmatmul.mubr.msk.bf16.vlgmr.msra.gmra.mrb[16].mxu0 %vm853_vm0, %v1160_v17 }
 0x54d   : > { %4244 = vmatprep.mubr.msk.bf16.mxu0 %vm4742_vm1, %v4741_v5  ;;  %4241 = vmatpush3.bf16.msra.mxu0 %v4625_v36 }
 0x54e   : > { %4242 = vmatprep.subr.bf16.mxu0 %v4741_v5 }
 0x551   : > { %4243 = vmatpush3.bf16.msra.mxu0 %v4626_v37 }
 0x552   : > { %4260 = vmatprep.subr.bf16.mxu0 %v4741_v5 }
 0x61f   : > { %v1210_v29 = vpop.f32.mrb[16].mxu0 }
 0x620   : > { %v1216_v30 = vadd.f32 %v1210_v29, %v4901_v0  ;;  %v4238_v31 = vpop.f32.mrb[17].mxu0  ;;  %v4627_v0 = vld [vmem:[%s5672_s13] sm:$0xff]  }
 0x621   : > { %v1213_v32 = vpop.f32.mrb[18].mxu0  ;;  %4249 = vmatpush3.bf16.msra.mxu1 %v4627_v0 }
 0x622   : > { %v4239_v33 = vpop.f32.mrb[19].mxu0  ;;  %v1218_v34 = vmul.f32 %v1216_v30, %v1216_v30  ;;  %4250 = vmatprep.subr.bf16.mxu1 %v4741_v5 }
 0x624   : > { %v1219_v35 = vsel %vm853_vm0, %v1218_v34, 0.0 }
 0x625   : > { %1220 = vadd.xlane.f32.xlu0 %v1219_v35  ;;  %4251 = vmatpush3.bf16.msra.mxu1 %v4628_v38 }
 0x626   : > { %4252 = vmatprep.subr.bf16.mxu1 %v4741_v5 }
 0x629   : > { %4253 = vmatpush3.bf16.msra.mxu1 %v4629_v39 }
 0x62a   : > { %4254 = vmatprep.subr.bf16.mxu1 %v4741_v5 }
 0x62d   : > { %4255 = vmatpush3.bf16.msra.mxu1 %v4630_v49 }
 0x62e   : > { %4577 = vmatprep.subr.bf16.mxu1 %v4746_v57 }
 0x6b2   : > { %v1221_v40 = vpop.xlane.xlu0 %1220 }
 0x6b3   : > { %v1222_v41 = vmul.f32 0.03125, %v1221_v40 }
 0x6b5   : > { %v1223_v42 = vadd.f32 1e-06, %v1222_v41 }
 0x6b7   : > { %4687 = vrsqrt.f32 %v1223_v42 }
 0x6c1   : > { %v4688_v43 = vpop.eup %4687 }
 0x6c2   : > { %v1225_v45 = vmul.f32 %v4688_v43, %v1216_v30 }
 0x6c4   : > { %v1230_v46 = vmul.f32 %v3891_v44, %v1225_v45 }
 0x6c6   : > { %v1235_v48 = vpack.c.bf16 %v1230_v46, %v1230_v46 }
 0x6c8   : > { %4245 = vmatmul.mubr.msk.bf16.vlgmr.msra.gmra.mrb[20].mxu0 %vm853_vm0, %v1235_v48 }
 0x6c9   : > { %4264 = vmatprep.mubr.msk.bf16.mxu0 %vm4742_vm1, %v4741_v5  ;;  %4261 = vmatpush3.bf16.msra.mxu0 %v4631_v3 }
 0x6ca   : > { %4262 = vmatprep.subr.bf16.mxu0 %v4741_v5 }
 0x6cd   : > { %4263 = vmatpush3.bf16.msra.mxu0 %v4632_v4 }
 0x6ce   : > { %4268 = vmatprep.subr.bf16.mxu0 %v4741_v5 }
 0x79b   : > { %v1285_v50 = vpop.f32.mrb[20].mxu0 }
 0x79c   : > { %v1291_v51 = vmax.f32 %v1285_v50, 0.0  ;;  %v4246_v52 = vpop.f32.mrb[21].mxu0 }
 0x79d   : > { %v1288_v53 = vpop.f32.mrb[22].mxu0 }
 0x79e   : > { %v1300_v54 = vpack.c.bf16 %v1291_v51, %v1291_v51  ;;  %v4247_v55 = vpop.f32.mrb[23].mxu0 }
 0x7a0   : > { %4257 = vmatmul.mubr.msk.bf16.vlgmr.msra.gmra.mrb[0].mxu1 %vm1325_vm2, %v1300_v54 }
 0x7a1   : > { %4579 = vmatpush3.bf16.msra.mxu1 %v5014_v58  ;;  %4284 = vmatprep.mubr.msk.f32.mxu1 %vm4742_vm1, %v4741_v5 }
 0x7a2   : > { %4580 = vmatprep.subr.bf16.mxu1 %v4746_v57 }
 0x7a5   : > { %4582 = vmatpush3.bf16.msra.mxu1 %v5020_v60 }
 0x7a6   : > { %4287 = vmatprep.subr.bf16.mxu1 %v4741_v5 }
 0x873   : > { %v1363_v56 = vpop.f32.mrb[0].mxu1 }
 0x874   : > { %v5083_v59 = vadd.f32 %v1363_v56, %v1216_v30  ;;  %v4258_v61 = vpop.f32.mrb[1].mxu1 }
 0x875   : > { %v1366_v62 = vpop.f32.mrb[2].mxu1 }
 0x876   : > { %v4259_v63 = vpop.f32.mrb[3].mxu1  ;;  %v1371_v1 = vmul.f32 %v5083_v59, %v5083_v59 }
 0x878   : > { %v1372_v2 = vsel %vm853_vm0, %v1371_v1, 0.0 }
 0x879   : > { %1373 = vadd.xlane.f32.xlu1 %v1372_v2 }
 0x906   : > { %v1374_v10 = vpop.xlane.xlu1 %1373 }
 0x907   : > { %v1375_v11 = vmul.f32 0.03125, %v1374_v10 }
 0x909   : > { %v1376_v12 = vadd.f32 1e-06, %v1375_v11 }
 0x90b   : > { %4689 = vrsqrt.f32 %v1376_v12  ;;  %v5147_v12 = vld [vmem:[%s826_s28] sm:$0xff] }
 0x915   : > { %v4690_v13 = vpop.eup %4689 }
 0x916   : > { %v1378_v15 = vmul.f32 %v4690_v13, %v5083_v59  ;;  %v1880_v13 = vmul.f32 %v5147_v12, %v5147_v12 }
 0x918   : > { %v1383_v16 = vmul.f32 %v3900_v14, %v1378_v15  ;;  %v1881_v14 = vsel %vm853_vm0, %v1880_v13, 0.0 }
 0x91a   : > { %v1389_v17 = vpack.c.bf16 %v1383_v16, %v1383_v16 }
 0x91c   : > { %4265 = vmatmul.mubr.msk.bf16.vlgmr.msra.gmra.mrb[24].mxu0 %vm853_vm0, %v1389_v17 }
 0x91d   : > { %4272 = vmatprep.mubr.msk.bf16.mxu0 %vm4742_vm1, %v4741_v5 }
 0x9ef   : > { %v1439_v25 = vpop.f32.mrb[24].mxu0 }
 0x9f0   : > { %v4266_v27 = vpop.f32.mrb[25].mxu0  ;;  %v1450_v28 = vmul.f32 %v1439_v25, %v4963_v18  ;;  %v1451_v29 = vmul.f32 %v1439_v25, %v4967_v20  ;;  %v1452_v33 = vmul.f32 %v1439_v25, %v4971_v22  ;;  %v1453_v34 = vmul.f32 %v1439_v25, %v4975_v24 }
 0x9f1   : > { %v1442_v30 = vpop.f32.mrb[26].mxu0  ;;  %v1454_v36 = vmul.f32 %v1439_v25, %v4965_v19  ;;  %v1455_v37 = vmul.f32 %v1439_v25, %v4969_v21  ;;  %v1458_v19 = vpack.c.bf16 %v1439_v25, %v1439_v25  ;;  %v1456_v48 = vmul.f32 %v1439_v25, %v4973_v23 }
 0x9f2   : > { %v4267_v31 = vpop.f32.mrb[27].mxu0  ;;  %v1459_v32 = vpack.c.bf16 %v1451_v29, %v1450_v28  ;;  %v1460_v35 = vpack.c.bf16 %v1453_v34, %v1452_v33  ;;  %v1457_v49 = vmul.f32 %v1439_v25, %v4977_v26  ;;  %v4633_v26 = vld [vmem:[%s5726_s10 + $0x10] sm:$0xff]   ;;  %v4639_v33 = vld [vmem:[%s5672_s13 + $0x20] sm:$0xff]  }
 0x9f3   : > { %v1598_v0 = vpack.c.bf16 %v1455_v37, %v1454_v36  ;;  %v4635_v30 = vld [vmem:[%s5727_s12 + $0x10] sm:$0xff]   ;;  %v4636_v31 = vld [vmem:[%s5727_s12 + $0x18] sm:$0xff]  }
 0x9f4   : > { %1463 = vrot.lane.b32.xlu1 %v1459_v32, %s5729_s1  ;;  %v1599_v50 = vpack.c.bf16 %v1457_v49, %v1456_v48  ;;  %v840_v32 = vld [vmem:[%s5732_s6] sm:$0xff]  ;;  %v842_v34 = vld [vmem:[%s5732_s6 + $0x10] sm:$0xff]  ;;  %v843_v36 = vld [vmem:[%s5732_s6 + $0x18] sm:$0xff] }
 0x9f5   : > { %v4641_v37 = vld [vmem:[%s5672_s13 + $0x30] sm:$0xff]   ;;  %v4637_v48 = vld [vmem:[%s5675_s16] sm:$0xff]  }
 0x9f6   : > { %v3940_v49 = vld [vmem:[%s5674_s15] ss:$0 sm:$0xff] }
 0x9f8   : > { %1465 = vrot.lane.b32.xlu1 %v1460_v35, %s5729_s1  ;;  %v4640_v35 = vld [vmem:[%s5672_s13 + $0x28] sm:$0xff]  }
 0x9fc   : > { %1602 = vrot.lane.b32.xlu1 %v1598_v0, %s5730_s11 }
 0xa66   : > { %v1464_v38 = vpop.permute.xlu1 %1463 }
 0xa67   : > { %v1471_v39 = vsel %vm853_vm0, %v1464_v38, 0 }
 0xa68   : > { %4269 = vmatpush3.bf16.xpose.msra.mxu0 %v1471_v39 }
 0xa69   : > { %4270 = vmatprep.subr.bf16.mxu0 %v4741_v5 }
 0xa6a   : > { %v1466_v40 = vpop.permute.xlu1 %1465 }
 0xa6b   : > { %v1474_v41 = vsel %vm853_vm0, %v1466_v40, 0 }
 0xa6e   : > { %v1603_v55 = vpop.permute.xlu1 %1602 }
 0xa70   : > { %4271 = vmatpush3.bf16.xpose.msra.mxu0 %v1474_v41 }
 0xa71   : > { %4295 = vmatprep.subr.bf16.mxu0 %v4741_v5 }
 0xa77   : > { %4273 = vmatmul.mubr.msk.bf16.vlgmr.msra.gmra.mrb[28].mxu0 %vm853_vm0, %v1458_v19 }
 0xa78   : > { %4299 = vmatprep.mubr.msk.bf16.mxu0 %vm4742_vm1, %v4741_v5  ;;  %4296 = vmatpush3.bf16.msra.mxu0 %v4633_v26 }
 0xa79   : > { %4297 = vmatprep.subr.bf16.mxu0 %v4741_v5 }
 0xb4a   : > { %v1510_v21 = vpop.f32.mrb[28].mxu0 }
 0xb4b   : > { %v1511_v42 = vadd.f32 %v1510_v21, %v5000_v47  ;;  %v4274_v43 = vpop.f32.mrb[29].mxu0  ;;  %v4634_v47 = vld [vmem:[%s5726_s10 + $0x18] sm:$0xff]  }
 0xb4c   : > { %v1513_v44 = vpop.f32.mrb[30].mxu0  ;;  %4298 = vmatpush3.bf16.msra.mxu0 %v4634_v47  ;;  %v3918_v43 = vld [vmem:[%s5728_s9 + $0x1] ss:$0 sm:$0xff] }
 0xb4d   : > { %v4275_v45 = vpop.f32.mrb[31].mxu0  ;;  %v1516_v46 = vsel %vm853_vm0, %v1511_v42, -inf  ;;  %4311 = vmatprep.subr.bf16.mxu0 %v4741_v5 }
 0xb4e   : > { %1517 = vmax.xlane.f32.xlu0 %v1516_v46 }
 0xb64   : > { %1604 = vrot.lane.b32.xlu0 %v1599_v50, %s5730_s11 }
 0xb83   : > { %1882 = vadd.xlane.f32.xlu0 %v1881_v14 }
 0xbdb   : > { %v1518_v51 = vpop.xlane.xlu0 %1517 }
 0xbdc   : > { %v1519_v52 = vsub.f32 %v1511_v42, %v1518_v51 }
 0xbde   : > { %v1520_v53 = vmul.f32 1.442695, %v1519_v52  ;;  %v4638_v52 = vld [vmem:[%s5675_s16 + $0x8] sm:$0xff]  }
 0xbdf   : > { %v1605_v23 = vpop.permute.xlu0 %1604 }
 0xbe0   : > { %4691 = vpow2.f32 %v1520_v53 }
 0xbea   : > { %v4692_v54 = vpop.eup %4691 }
 0xbeb   : > { %4285 = vmatmul.mubr.msk.f32.vlgmr.msra.gmra.mrb[4].mxu1 %vm853_vm0, %v4692_v54 }
 0xbec   : > { %4288 = vmatpush3.bf16.msra.mxu1 %v1603_v55  ;;  %4291 = vmatprep.mubr.msk.bf16.mxu1 %vm4742_vm1, %v4741_v5 }
 0xbed   : > { %4289 = vmatprep.subr.bf16.mxu1 %v4741_v5 }
 0xbf0   : > { %4290 = vmatpush3.bf16.msra.mxu1 %v1605_v23 }
 0xbf1   : > { %4303 = vmatprep.subr.bf16.mxu1 %v4741_v5 }
 0xc10   : > { %v1883_v0 = vpop.xlane.xlu0 %1882 }
 0xc11   : > { %v1884_v38 = vmul.f32 0.03125, %v1883_v0 }
 0xc13   : > { %v1885_v40 = vadd.f32 1e-06, %v1884_v38 }
 0xcbe   : > { %v1591_v56 = vpop.f32.mrb[4].mxu1 }
 0xcbf   : > { %4693 = vrcp.f32 %v1591_v56  ;;  %v4286_v61 = vpop.f32.mrb[5].mxu1 }
 0xcc0   : > { %4695 = vrsqrt.f32 %v1885_v40 }
 0xcc9   : > { %v4694_v62 = vpop.eup %4693 }
 0xcca   : > { %v1596_v63 = vmul.f32 %v4694_v62, %v4692_v54  ;;  %v4696_v21 = vpop.eup %4695  ;;  %v4642_v54 = vld [vmem:[%s5672_s13 + $0x38] sm:$0xff]  }
 0xccb   : > { %v1887_v45 = vmul.f32 %v4696_v21, %v5147_v12 }
 0xccc   : > { %v1597_v1 = vpack.c.bf16 %v1596_v63, %v1596_v63 }
 0xccd   : > { %v1892_v51 = vmul.f32 %v3940_v49, %v1887_v45 }
 0xcce   : > { %4292 = vmatmul.mubr.msk.bf16.vlgmr.msra.gmra.mrb[8].mxu1 %vm853_vm0, %v1597_v1 }
 0xccf   : > { %4307 = vmatprep.mubr.msk.bf16.mxu1 %vm4742_vm1, %v4741_v5  ;;  %4304 = vmatpush3.bf16.msra.mxu1 %v4635_v30  ;;  %v1897_v53 = vpack.c.bf16 %v1892_v51, %v1892_v51 }
 0xcd0   : > { %4305 = vmatprep.subr.bf16.mxu1 %v4741_v5 }
 0xcd3   : > { %4306 = vmatpush3.bf16.msra.mxu1 %v4636_v31 }
 0xcd4   : > { %4323 = vmatprep.subr.bf16.mxu1 %v4741_v5 }
 0xda1   : > { %v1645_v2 = vpop.f32.mrb[8].mxu1 }
 0xda2   : > { %v1651_v3 = vpack.c.bf16 %v1645_v2, %v1645_v2  ;;  %v4293_v4 = vpop.f32.mrb[9].mxu1 }
 0xda3   : > { %v1648_v10 = vpop.f32.mrb[10].mxu1 }
 0xda4   : > { %v4294_v11 = vpop.f32.mrb[11].mxu1  ;;  %4300 = vmatmul.mubr.msk.bf16.vlgmr.msra.gmra.mrb[32].mxu0 %vm853_vm0, %v1651_v3 }
 0xda5   : > { %4319 = vmatprep.mubr.msk.bf16.mxu0 %vm4742_vm1, %v4741_v5  ;;  %4312 = vmatpush3.bf16.msra.mxu0 %v4639_v33 }
 0xda6   : > { %4313 = vmatprep.subr.bf16.mxu0 %v4741_v5 }
 0xda9   : > { %4314 = vmatpush3.bf16.msra.mxu0 %v4640_v35 }
 0xdaa   : > { %4315 = vmatprep.subr.bf16.mxu0 %v4741_v5 }
 0xdad   : > { %4316 = vmatpush3.bf16.msra.mxu0 %v4641_v37 }
 0xdae   : > { %4317 = vmatprep.subr.bf16.mxu0 %v4741_v5 }
 0xdb1   : > { %4318 = vmatpush3.bf16.msra.mxu0 %v4642_v54  ;;  %v845_v54 = vld [vmem:[%s5735_s2 + $0x8] sm:$0xff] }
 0xdb2   : > { %4583 = vmatprep.subr.bf16.mxu0 %v4746_v57 }
 0xe77   : > { %v1701_v15 = vpop.f32.mrb[32].mxu0 }
 0xe78   : > { %v5153_v16 = vadd.f32 %v1701_v15, %v5083_v59  ;;  %v4301_v17 = vpop.f32.mrb[33].mxu0  ;;  %v841_v59 = vld [vmem:[%s5732_s6 + $0x8] sm:$0xff] }
 0xe79   : > { %v1704_v25 = vpop.f32.mrb[34].mxu0  ;;  %1963 = vrot.lane.b32.xlu0 %v841_v59, %s5733_s4 }
 0xe7a   : > { %v4302_v27 = vpop.f32.mrb[35].mxu0  ;;  %v1709_v28 = vmul.f32 %v5153_v16, %v5153_v16 }
 0xe7c   : > { %v1710_v29 = vsel %vm853_vm0, %v1709_v28, 0.0 }
 0xe7d   : > { %1711 = vadd.xlane.f32.xlu1 %v1710_v29  ;;  %1977 = vrot.lane.b32.xlu0 %v840_v32, %s5730_s11 }
 0xe81   : > { %1979 = vrot.lane.b32.xlu0 %v841_v59, %s5730_s11 }
 0xe85   : > { %1981 = vrot.lane.b32.xlu0 %v842_v34, %s5730_s11 }
 0xe89   : > { %1983 = vrot.lane.b32.xlu0 %v843_v36, %s5730_s11 }
 0xe8e   : > { %1961 = vrot.lane.b32.xlu1 %v840_v32, %s5733_s4 }
 0xe92   : > { %1965 = vrot.lane.b32.xlu1 %v842_v34, %s5733_s4 }
 0xe96   : > { %1967 = vrot.lane.b32.xlu1 %v843_v36, %s5733_s4  ;;  %s5734_s4 = sld [smem:[#allocation6_spill]] }
 0xeeb   : > { %v5224_v55 = vpop.permute.xlu0 %1963 }
 0xeef   : > { %v5226_v23 = vpop.permute.xlu0 %1977 }
 0xef3   : > { %v5228_v26 = vpop.permute.xlu0 %1979 }
 0xef7   : > { %v5232_v1 = vpop.permute.xlu0 %1981 }
 0xefb   : > { %v5239_v10 = vpop.permute.xlu0 %1983 }
 0xf0a   : > { %v1712_v39 = vpop.xlane.xlu1 %1711 }
 0xf0b   : > { %v1713_v41 = vmul.f32 0.03125, %v1712_v39 }
 0xf0d   : > { %v1714_v19 = vadd.f32 1e-06, %v1713_v41 }
 0xf0e   : > { %v5230_v47 = vpop.permute.xlu1 %1961 }
 0xf0f   : > { %4697 = vrsqrt.f32 %v1714_v19 }
 0xf12   : > { %v5234_v4 = vpop.permute.xlu1 %1965 }
 0xf16   : > { %v5241_v13 = vpop.permute.xlu1 %1967 }
 0xf19   : > { %v4698_v42 = vpop.eup %4697 }
 0xf1a   : > { %v1716_v44 = vmul.f32 %v4698_v42, %v5153_v16 }
 0xf1c   : > { %v1721_v46 = vmul.f32 %v3918_v43, %v1716_v44 }
 0xf1e   : > { %v1727_v50 = vpack.c.bf16 %v1721_v46, %v1721_v46  ;;  %v5267_v46 = vld [vmem:[%s5734_s4] sm:$0xff]  ;;  %s830_s4 = scalar_lea.vmem %s5686_s27, %s4895_s8 }
 0xf20   : > { %4308 = vmatmul.mubr.msk.bf16.vlgmr.msra.gmra.mrb[12].mxu1 %vm853_vm0, %v1727_v50 }
 0xf21   : > { %4324 = vmatpush3.bf16.msra.mxu1 %v4637_v48  ;;  %4327 = vmatprep.mubr.msk.bf16.mxu1 %vm4742_vm1, %v4741_v5 }
 0xf22   : > { %4325 = vmatprep.subr.bf16.mxu1 %v4741_v5 }
 0xf25   : > { %4326 = vmatpush3.bf16.msra.mxu1 %v4638_v52 }
 0xf26   : > { %4331 = vmatprep.subr.bf16.mxu1 %v4741_v5 }
 0xf28   : > { %4328 = vmatmul.mubr.msk.bf16.vlgmr.msra.gmra.mrb[16].mxu1 %vm853_vm0, %v1897_v53  ;;  %v844_v53 = vld [vmem:[%s5735_s2] sm:$0xff] }
 0xf29   : > { %4335 = vmatprep.mubr.msk.bf16.mxu1 %vm4742_vm1, %v4741_v5 }
 0xff3   : > { %v1777_v56 = vpop.f32.mrb[12].mxu1 }
 0xff4   : > { %v1783_v61 = vmax.f32 %v1777_v56, 0.0  ;;  %v4309_v62 = vpop.f32.mrb[13].mxu1  ;;  %v846_v56 = vld [vmem:[%s5735_s2 + $0x10] sm:$0xff] }
 0xff5   : > { %v1780_v63 = vpop.f32.mrb[14].mxu1  ;;  %v847_v62 = vld [vmem:[%s5735_s2 + $0x18] sm:$0xff] }
 0xff6   : > { %v1793_v2 = vpack.c.bf16 %v1783_v61, %v1783_v61  ;;  %v4310_v3 = vpop.f32.mrb[15].mxu1  ;;  %v5280_v61 = vpack.c.bf16 %v845_v54, %v844_v53  ;;  %v5286_v63 = vpack.c.bf16 %v847_v62, %v846_v56 }
 0xff8   : > { %4320 = vmatmul.mubr.msk.bf16.vlgmr.msra.gmra.mrb[36].mxu0 %vm1325_vm2, %v1793_v2 }
 0xff9   : > { %4347 = vmatprep.mubr.msk.f32.mxu0 %vm4742_vm1, %v4741_v5  ;;  %4585 = vmatpush3.bf16.msra.mxu0 %v5280_v61 }
 0xffa   : > { %4586 = vmatprep.subr.bf16.mxu0 %v4746_v57 }
 0xffb   : > { %v1947_v11 = vpop.f32.mrb[16].mxu1 }
 0xffc   : > { %v4329_v14 = vpop.f32.mrb[17].mxu1  ;;  %v1989_v15 = vmul.f32 %v5226_v23, %v1947_v11  ;;  %v1990_v17 = vmul.f32 %v5228_v26, %v1947_v11  ;;  %v1973_v27 = vmul.f32 %v5230_v47, %v1947_v11  ;;  %v1974_v28 = vmul.f32 %v5224_v55, %v1947_v11 }
 0xffd   : > { %v1950_v25 = vpop.f32.mrb[18].mxu1  ;;  %v1991_v31 = vmul.f32 %v5232_v1, %v1947_v11  ;;  %v1992_v59 = vmul.f32 %v5239_v10, %v1947_v11  ;;  %v1975_v32 = vmul.f32 %v5234_v4, %v1947_v11  ;;  %v1976_v33 = vmul.f32 %v5241_v13, %v1947_v11  ;;  %4588 = vmatpush3.bf16.msra.mxu0 %v5286_v63 }
 0xffe   : > { %v4330_v29 = vpop.f32.mrb[19].mxu1  ;;  %v2133_v30 = vpack.c.bf16 %v1990_v17, %v1989_v15  ;;  %v1994_v34 = vpack.c.bf16 %v1974_v28, %v1973_v27  ;;  %v1993_v40 = vpack.c.bf16 %v1947_v11, %v1947_v11  ;;  %4350 = vmatprep.subr.bf16.mxu0 %v4741_v5  ;;  %v4643_v25 = vld [vmem:[%s5676_s17] sm:$0xff]   ;;  %v4644_v27 = vld [vmem:[%s5676_s17 + $0x8] sm:$0xff]  }
 0xfff   : > { %v2134_v35 = vpack.c.bf16 %v1992_v59, %v1991_v31  ;;  %v1995_v36 = vpack.c.bf16 %v1976_v33, %v1975_v32 }
0x1000   : > { %2137 = vrot.lane.b32.xlu0 %v2133_v30, %s5730_s11  ;;  %1998 = vrot.lane.b32.xlu1 %v1994_v34, %s5729_s1 }
0x1004   : > { %2139 = vrot.lane.b32.xlu0 %v2134_v35, %s5730_s11  ;;  %2000 = vrot.lane.b32.xlu1 %v1995_v36, %s5729_s1 }
0x1072   : > { %v1999_v37 = vpop.permute.xlu1 %1998  ;;  %v2138_v14 = vpop.permute.xlu0 %2137 }
0x1073   : > { %v2006_v0 = vsel %vm853_vm0, %v1999_v37, 0  ;;  %v4645_v37 = vld [vmem:[%s5679_s20] sm:$0xff]  }
0x1074   : > { %4332 = vmatpush3.bf16.xpose.msra.mxu1 %v2006_v0 }
0x1075   : > { %4333 = vmatprep.subr.bf16.mxu1 %v4741_v5 }
0x1076   : > { %v2001_v38 = vpop.permute.xlu1 %2000  ;;  %v2140_v17 = vpop.permute.xlu0 %2139 }
0x1077   : > { %v2009_v39 = vsel %vm853_vm0, %v2001_v38, 0 }
0x107c   : > { %4334 = vmatpush3.bf16.xpose.msra.mxu1 %v2009_v39 }
0x107d   : > { %4358 = vmatprep.subr.bf16.mxu1 %v4741_v5 }
0x1083   : > { %4336 = vmatmul.mubr.msk.bf16.vlgmr.msra.gmra.mrb[20].mxu1 %vm853_vm0, %v1993_v40 }
0x1084   : > { %4362 = vmatprep.mubr.msk.bf16.mxu1 %vm4742_vm1, %v4741_v5  ;;  %4359 = vmatpush3.bf16.msra.mxu1 %v4643_v25 }
0x1085   : > { %4360 = vmatprep.subr.bf16.mxu1 %v4741_v5 }
0x1088   : > { %4361 = vmatpush3.bf16.msra.mxu1 %v4644_v27 }
0x1089   : > { %4374 = vmatprep.subr.bf16.mxu1 %v4741_v5 }
0x10cb   : > { %v1855_v41 = vpop.f32.mrb[36].mxu0 }
0x10cc   : > { %v1861_v19 = vadd.f32 %v1855_v41, %v5153_v16  ;;  %v4321_v21 = vpop.f32.mrb[37].mxu0  ;;  %v3939_v41 = vld [vmem:[%s5673_s14] ss:$0 sm:$0xff] }
0x10cd   : > { %v1858_v42 = vpop.f32.mrb[38].mxu0 }
0x10ce   : > { %v4322_v43 = vpop.f32.mrb[39].mxu0  ;;  %v1863_v44 = vmul.f32 %v1861_v19, %v1861_v19  ;;  %v4646_v42 = vld [vmem:[%s5679_s20 + $0x8] sm:$0xff]  }
0x10d0   : > { %v1864_v45 = vsel %vm853_vm0, %v1863_v44, 0.0 }
0x10d1   : > { %1865 = vadd.xlane.f32.xlu0 %v1864_v45 }
0x1156   : > { %v2045_v48 = vpop.f32.mrb[20].mxu1 }
0x1157   : > { %v2046_v49 = vadd.f32 %v2045_v48, %v5267_v46  ;;  %v4337_v50 = vpop.f32.mrb[21].mxu1 }
0x1158   : > { %v2048_v51 = vpop.f32.mrb[22].mxu1 }
0x1159   : > { %v4338_v52 = vpop.f32.mrb[23].mxu1  ;;  %v2051_v16 = vsel %vm853_vm0, %v2046_v49, -inf }
0x115a   : > { %2052 = vmax.xlane.f32.xlu1 %v2051_v16 }
0x115e   : > { %v1866_v32 = vpop.xlane.xlu0 %1865 }
0x115f   : > { %v1867_v33 = vmul.f32 0.03125, %v1866_v32 }
0x1161   : > { %v1868_v34 = vadd.f32 1e-06, %v1867_v33 }
0x11e7   : > { %v2053_v2 = vpop.xlane.xlu1 %2052 }
0x11e8   : > { %v2054_v3 = vsub.f32 %v2046_v49, %v2053_v2 }
0x11ea   : > { %v2055_v11 = vmul.f32 1.442695, %v2054_v3 }
0x11ec   : > { %4699 = vpow2.f32 %v2055_v11  ;;  %v4648_v11 = vld [vmem:[%s5678_s19 + $0x8] sm:$0xff]  }
0x11f6   : > { %v4700_v15 = vpop.eup %4699 }
0x11f7   : > { %4348 = vmatmul.mubr.msk.f32.vlgmr.msra.gmra.mrb[10].mxu0 %vm853_vm0, %v4700_v15 }
0x11f8   : > { %4351 = vmatpush3.bf16.msra.mxu0 %v2138_v14  ;;  %4354 = vmatprep.mubr.msk.bf16.mxu0 %vm4742_vm1, %v4741_v5 }
0x11f9   : > { %4352 = vmatprep.subr.bf16.mxu0 %v4741_v5 }
0x11fc   : > { %4353 = vmatpush3.bf16.msra.mxu0 %v2140_v17 }
0x11fd   : > { %4366 = vmatprep.subr.bf16.mxu0 %v4741_v5 }
0x12ca   : > { %v2126_v28 = vpop.f32.mrb[10].mxu0 }
0x12cb   : > { %4701 = vrcp.f32 %v2126_v28  ;;  %v4349_v29 = vpop.f32.mrb[11].mxu0 }
0x12cc   : > { %4703 = vrsqrt.f32 %v1868_v34  ;;  %v3950_v29 = vld [vmem:[%s5677_s18] ss:$0 sm:$0xff] }
0x12d5   : > { %v4702_v30 = vpop.eup %4701 }
0x12d6   : > { %v2131_v31 = vmul.f32 %v4702_v30, %v4700_v15  ;;  %v4704_v35 = vpop.eup %4703 }
0x12d7   : > { %v1870_v0 = vmul.f32 %v4704_v35, %v1861_v19 }
0x12d8   : > { %v2132_v59 = vpack.c.bf16 %v2131_v31, %v2131_v31 }
0x12d9   : > { %v1877_v19 = vmul.f32 %v3939_v41, %v1870_v0 }
0x12da   : > { %4355 = vmatmul.mubr.msk.bf16.vlgmr.msra.gmra.mrb[40].mxu0 %vm853_vm0, %v2132_v59 }
0x12db   : > { %4370 = vmatprep.mubr.msk.bf16.mxu0 %vm4742_vm1, %v4741_v5  ;;  %v5320_v43 = vpack.c.bf16 %v1877_v19, %v1877_v19 }
0x13ad   : > { %v2180_v36 = vpop.f32.mrb[40].mxu0 }
0x13ae   : > { %v2186_v38 = vpack.c.bf16 %v2180_v36, %v2180_v36  ;;  %v4356_v39 = vpop.f32.mrb[41].mxu0 }
0x13af   : > { %v2183_v40 = vpop.f32.mrb[42].mxu0 }
0x13b0   : > { %v4357_v21 = vpop.f32.mrb[43].mxu0  ;;  %4363 = vmatmul.mubr.msk.bf16.vlgmr.msra.gmra.mrb[24].mxu1 %vm853_vm0, %v2186_v38 }
0x13b1   : > { %4375 = vmatpush3.bf16.msra.mxu1 %v4645_v37  ;;  %4378 = vmatprep.mubr.msk.bf16.mxu1 %vm4742_vm1, %v4741_v5 }
0x13b2   : > { %4376 = vmatprep.subr.bf16.mxu1 %v4741_v5 }
0x13b5   : > { %4377 = vmatpush3.bf16.msra.mxu1 %v4646_v42 }
0x13b6   : > { %4589 = vmatprep.subr.bf16.mxu1 %v4746_v57 }
0x13b8   : > { %4379 = vmatmul.mubr.msk.bf16.vlgmr.msra.gmra.mrb[28].mxu1 %vm853_vm0, %v5320_v43 }
0x13b9   : > { %4591 = vmatpush3.bf16.msra.mxu1 %v5014_v58  ;;  %4398 = vmatprep.mubr.msk.f32.mxu1 %vm4742_vm1, %v4741_v5 }
0x13ba   : > { %4592 = vmatprep.subr.bf16.mxu1 %v4746_v57 }
0x13bd   : > { %4594 = vmatpush3.bf16.msra.mxu1 %v5020_v60 }
0x13be   : > { %4401 = vmatprep.subr.bf16.mxu1 %v4741_v5 }
0x1483   : > { %v2236_v44 = vpop.f32.mrb[24].mxu1 }
0x1484   : > { %v5332_v45 = vadd.f32 %v2236_v44, %v5147_v12  ;;  %v4364_v48 = vpop.f32.mrb[25].mxu1  ;;  %v4647_v12 = vld [vmem:[%s5678_s19] sm:$0xff]  }
0x1485   : > { %v2239_v49 = vpop.f32.mrb[26].mxu1  ;;  %4367 = vmatpush3.bf16.msra.mxu0 %v4647_v12 }
0x1486   : > { %v4365_v50 = vpop.f32.mrb[27].mxu1  ;;  %v2244_v51 = vmul.f32 %v5332_v45, %v5332_v45  ;;  %4368 = vmatprep.subr.bf16.mxu0 %v4741_v5 }
0x1488   : > { %v2245_v52 = vsel %vm853_vm0, %v2244_v51, 0.0 }
0x1489   : > { %2246 = vadd.xlane.f32.xlu1 %v2245_v52  ;;  %4369 = vmatpush3.bf16.msra.mxu0 %v4648_v11 }
0x148a   : > { %4382 = vmatprep.subr.bf16.mxu0 %v4741_v5 }
0x148b   : > { %v2371_v16 = vpop.f32.mrb[28].mxu1 }
0x148c   : > { %v4380_v53 = vpop.f32.mrb[29].mxu1  ;;  %v2387_v54 = vmul.f32 %v2371_v16, %v4971_v22  ;;  %v2388_v56 = vmul.f32 %v2371_v16, %v4975_v24  ;;  %v2381_v25 = vmul.f32 %v2371_v16, %v4923_v6  ;;  %v2382_v27 = vmul.f32 %v2371_v16, %v4928_v7 }
0x148d   : > { %v2374_v62 = vpop.f32.mrb[30].mxu1  ;;  %v2383_v34 = vmul.f32 %v2371_v16, %v4937_v8  ;;  %v2384_v6 = vmul.f32 %v2371_v16, %v4946_v9  ;;  %v2385_v42 = vmul.f32 %v2371_v16, %v4963_v18  ;;  %v2386_v19 = vmul.f32 %v2371_v16, %v4967_v20  ;;  %v4649_v16 = vld [vmem:[%s5680_s21] sm:$0xff]  }
0x148e   : > { %v4381_v2 = vpop.f32.mrb[31].mxu1  ;;  %v2524_v3 = vpack.c.bf16 %v2388_v56, %v2387_v54  ;;  %v2390_v59 = vpack.c.bf16 %v2382_v27, %v2381_v25  ;;  %v4650_v54 = vld [vmem:[%s5680_s21 + $0x8] sm:$0xff]  }
0x148f   : > { %v2391_v7 = vpack.c.bf16 %v2384_v6, %v2383_v34  ;;  %v2523_v44 = vpack.c.bf16 %v2386_v19, %v2385_v42  ;;  %v4652_v34 = vld [vmem:[%s5682_s23 + $0x8] sm:$0xff]  }
0x1490   : > { %2529 = vrot.lane.b32.xlu0 %v2524_v3, %s5729_s1  ;;  %v2396_v33 = vsel %vm853_vm0, %v2390_v59, 0  ;;  %v4654_v6 = vld [vmem:[%s5683_s24 + $0x8] sm:$0xff]  }
0x1491   : > { %v2399_v35 = vsel %vm853_vm0, %v2391_v7, 0  ;;  %v4655_v7 = vld [vmem:[%s5683_s24 + $0x10] sm:$0xff]  }
0x1502   : > { %v2530_v53 = vpop.permute.xlu0 %2529 }
0x1516   : > { %v2247_v14 = vpop.xlane.xlu1 %2246 }
0x1517   : > { %v2248_v15 = vmul.f32 0.03125, %v2247_v14 }
0x1519   : > { %v2249_v17 = vadd.f32 1e-06, %v2248_v15 }
0x151b   : > { %4705 = vrsqrt.f32 %v2249_v17 }
0x1525   : > { %v4706_v28 = vpop.eup %4705 }
0x1526   : > { %v2251_v30 = vmul.f32 %v4706_v28, %v5332_v45 }
0x1528   : > { %v2256_v31 = vmul.f32 %v3950_v29, %v2251_v30 }
0x152a   : > { %v2261_v32 = vpack.c.bf16 %v2256_v31, %v2256_v31 }
0x152c   : > { %4371 = vmatmul.mubr.msk.bf16.vlgmr.msra.gmra.mrb[44].mxu0 %vm853_vm0, %v2261_v32 }
0x152d   : > { %4383 = vmatpush3.bf16.xpose.msra.mxu0 %v2396_v33  ;;  %4386 = vmatprep.mubr.msk.bf16.mxu0 %vm4742_vm1, %v4741_v5  ;;  %v4651_v33 = vld [vmem:[%s5682_s23] sm:$0xff]  }
0x152e   : > { %4384 = vmatprep.subr.bf16.mxu0 %v4741_v5 }
0x1535   : > { %4385 = vmatpush3.bf16.xpose.msra.mxu0 %v2399_v35 }
0x1536   : > { %4409 = vmatprep.subr.bf16.mxu0 %v4741_v5 }
0x15ff   : > { %v2311_v36 = vpop.f32.mrb[44].mxu0 }
0x1600   : > { %v2389_v37 = vpack.c.bf16 %v2311_v36, %v2311_v36  ;;  %v4372_v0 = vpop.f32.mrb[45].mxu0 }
0x1601   : > { %v2314_v38 = vpop.f32.mrb[46].mxu0 }
0x1602   : > { %v4373_v39 = vpop.f32.mrb[47].mxu0  ;;  %4387 = vmatmul.mubr.msk.bf16.vlgmr.msra.gmra.mrb[48].mxu0 %vm853_vm0, %v2389_v37  ;;  %v3963_v38 = vld [vmem:[%s5681_s22] ss:$0 sm:$0xff] }
0x1603   : > { %4413 = vmatprep.mubr.msk.bf16.mxu0 %vm4742_vm1, %v4741_v5  ;;  %4410 = vmatpush3.bf16.msra.mxu0 %v4649_v16 }
0x1604   : > { %4411 = vmatprep.subr.bf16.mxu0 %v4741_v5 }
0x1607   : > { %4412 = vmatpush3.bf16.msra.mxu0 %v4650_v54  ;;  %v4657_v54 = vld [vmem:[%s5675_s16 + $0x10] sm:$0xff]  }
0x1608   : > { %4425 = vmatprep.subr.bf16.mxu0 %v4741_v5 }
0x16d5   : > { %v2435_v8 = vpop.f32.mrb[48].mxu0 }
0x16d6   : > { %v4388_v9 = vpop.f32.mrb[49].mxu0  ;;  %v2441_v40 = vsel %vm853_vm0, %v2435_v8, -inf }
0x16d7   : > { %2442 = vmax.xlane.f32.xlu1 %v2441_v40  ;;  %v2438_v41 = vpop.f32.mrb[50].mxu0  ;;  %v4656_v40 = vld [vmem:[%s5683_s24 + $0x18] sm:$0xff]  }
0x16d8   : > { %v4389_v21 = vpop.f32.mrb[51].mxu0 }
0x16e8   : > { %2527 = vrot.lane.b32.xlu1 %v2523_v44, %s5729_s1 }
0x1764   : > { %v2443_v48 = vpop.xlane.xlu1 %2442 }
0x1765   : > { %v2444_v49 = vsub.f32 %v2435_v8, %v2443_v48 }
0x1767   : > { %v2445_v50 = vmul.f32 1.442695, %v2444_v49 }
0x1768   : > { %v2528_v52 = vpop.permute.xlu1 %2527 }
0x1769   : > { %4707 = vpow2.f32 %v2445_v50 }
0x1773   : > { %v4708_v51 = vpop.eup %4707 }
0x1774   : > { %4399 = vmatmul.mubr.msk.f32.vlgmr.msra.gmra.mrb[6].mxu1 %vm853_vm0, %v4708_v51 }
0x1775   : > { %4402 = vmatpush3.bf16.msra.mxu1 %v2528_v52  ;;  %4405 = vmatprep.mubr.msk.bf16.mxu1 %vm4742_vm1, %v4741_v5 }
0x1776   : > { %4403 = vmatprep.subr.bf16.mxu1 %v4741_v5 }
0x1779   : > { %4404 = vmatpush3.bf16.msra.mxu1 %v2530_v53 }
0x177a   : > { %4417 = vmatprep.subr.bf16.mxu1 %v4741_v5 }
0x1847   : > { %v2516_v56 = vpop.f32.mrb[6].mxu1 }
0x1848   : > { %4709 = vrcp.f32 %v2516_v56  ;;  %v4400_v62 = vpop.f32.mrb[7].mxu1 }
0x1852   : > { %v4710_v2 = vpop.eup %4709 }
0x1853   : > { %v2521_v3 = vmul.f32 %v4710_v2, %v4708_v51 }
0x1855   : > { %v2522_v12 = vpack.c.bf16 %v2521_v3, %v2521_v3 }
0x1857   : > { %4406 = vmatmul.mubr.msk.bf16.vlgmr.msra.gmra.mrb[32].mxu1 %vm853_vm0, %v2522_v12  ;;  %v3972_v12 = vld [vmem:[%s5674_s15 + $0x1] ss:$0 sm:$0xff] }
0x1858   : > { %4421 = vmatprep.mubr.msk.bf16.mxu1 %vm4742_vm1, %v4741_v5  ;;  %4418 = vmatpush3.bf16.msra.mxu1 %v4651_v33 }
0x1859   : > { %4419 = vmatprep.subr.bf16.mxu1 %v4741_v5 }
0x185c   : > { %4420 = vmatpush3.bf16.msra.mxu1 %v4652_v34 }
0x185d   : > { %4437 = vmatprep.subr.bf16.mxu1 %v4741_v5 }
0x192a   : > { %v2570_v11 = vpop.f32.mrb[32].mxu1 }
0x192b   : > { %v2576_v14 = vpack.c.bf16 %v2570_v11, %v2570_v11  ;;  %v4407_v15 = vpop.f32.mrb[33].mxu1 }
0x192c   : > { %v2573_v17 = vpop.f32.mrb[34].mxu1 }
0x192d   : > { %v4408_v25 = vpop.f32.mrb[35].mxu1  ;;  %4414 = vmatmul.mubr.msk.bf16.vlgmr.msra.gmra.mrb[52].mxu0 %vm853_vm0, %v2576_v14 }
0x192e   : > { %4433 = vmatprep.mubr.msk.bf16.mxu0 %vm4742_vm1, %v4741_v5 }
0x1a00   : > { %v2626_v27 = vpop.f32.mrb[52].mxu0 }
0x1a01   : > { %v2632_v28 = vadd.f32 %v2626_v27, %v5332_v45  ;;  %v4415_v29 = vpop.f32.mrb[53].mxu0  ;;  %v4653_v45 = vld [vmem:[%s5683_s24] sm:$0xff]  }
0x1a02   : > { %v2629_v30 = vpop.f32.mrb[54].mxu0  ;;  %4426 = vmatpush3.bf16.msra.mxu0 %v4653_v45 }
0x1a03   : > { %v4416_v31 = vpop.f32.mrb[55].mxu0  ;;  %v2634_v59 = vmul.f32 %v2632_v28, %v2632_v28  ;;  %4427 = vmatprep.subr.bf16.mxu0 %v4741_v5 }
0x1a05   : > { %v2635_v32 = vsel %vm853_vm0, %v2634_v59, 0.0 }
0x1a06   : > { %2636 = vadd.xlane.f32.xlu1 %v2635_v32  ;;  %4428 = vmatpush3.bf16.msra.mxu0 %v4654_v6 }
0x1a07   : > { %4429 = vmatprep.subr.bf16.mxu0 %v4741_v5 }
0x1a0a   : > { %4430 = vmatpush3.bf16.msra.mxu0 %v4655_v7 }
0x1a0b   : > { %4431 = vmatprep.subr.bf16.mxu0 %v4741_v5 }
0x1a0e   : > { %4432 = vmatpush3.bf16.msra.mxu0 %v4656_v40 }
0x1a0f   : > { %4595 = vmatprep.subr.bf16.mxu0 %v4746_v57 }
0x1a93   : > { %v2637_v35 = vpop.xlane.xlu1 %2636 }
0x1a94   : > { %v2638_v36 = vmul.f32 0.03125, %v2637_v35 }
0x1a96   : > { %v2639_v37 = vadd.f32 1e-06, %v2638_v36 }
0x1a98   : > { %4711 = vrsqrt.f32 %v2639_v37 }
0x1aa2   : > { %v4712_v0 = vpop.eup %4711 }
0x1aa3   : > { %v2641_v39 = vmul.f32 %v4712_v0, %v2632_v28 }
0x1aa5   : > { %v2646_v8 = vmul.f32 %v3963_v38, %v2641_v39 }
0x1aa7   : > { %v2651_v9 = vpack.c.bf16 %v2646_v8, %v2646_v8 }
0x1aa9   : > { %4422 = vmatmul.mubr.msk.bf16.vlgmr.msra.gmra.mrb[36].mxu1 %vm853_vm0, %v2651_v9 }
0x1aaa   : > { %4441 = vmatprep.mubr.msk.bf16.mxu1 %vm4742_vm1, %v4741_v5  ;;  %4438 = vmatpush3.bf16.msra.mxu1 %v4657_v54 }
0x1aab   : > { %4439 = vmatprep.subr.bf16.mxu1 %v4741_v5 }
0x1b7c   : > { %v2701_v41 = vpop.f32.mrb[36].mxu1 }
0x1b7d   : > { %v2707_v21 = vmax.f32 %v2701_v41, 0.0  ;;  %v4423_v42 = vpop.f32.mrb[37].mxu1 }
0x1b7e   : > { %v2704_v19 = vpop.f32.mrb[38].mxu1  ;;  %v4660_v42 = vld [vmem:[%s5676_s17 + $0x18] sm:$0xff]  }
0x1b7f   : > { %v2716_v44 = vpack.c.bf16 %v2707_v21, %v2707_v21  ;;  %v4424_v48 = vpop.f32.mrb[39].mxu1  ;;  %v4659_v21 = vld [vmem:[%s5676_s17 + $0x10] sm:$0xff]  }
0x1b81   : > { %4434 = vmatmul.mubr.msk.bf16.vlgmr.msra.gmra.mrb[56].mxu0 %vm1325_vm2, %v2716_v44 }
0x1b82   : > { %4597 = vmatpush3.bf16.msra.mxu0 %v5280_v61  ;;  %4461 = vmatprep.mubr.msk.f32.mxu0 %vm4742_vm1, %v4741_v5 }
0x1b83   : > { %4598 = vmatprep.subr.bf16.mxu0 %v4746_v57 }
0x1b86   : > { %4600 = vmatpush3.bf16.msra.mxu0 %v5286_v63  ;;  %v4658_v63 = vld [vmem:[%s5675_s16 + $0x18] sm:$0xff]  }
0x1b87   : > { %4464 = vmatprep.subr.bf16.mxu0 %v4741_v5  ;;  %4440 = vmatpush3.bf16.msra.mxu1 %v4658_v63 }
0x1b88   : > { %4445 = vmatprep.subr.bf16.mxu1 %v4741_v5 }
0x1c54   : > { %v2778_v49 = vpop.f32.mrb[56].mxu0 }
0x1c55   : > { %v5428_v50 = vadd.f32 %v2778_v49, %v2632_v28  ;;  %v4435_v51 = vpop.f32.mrb[57].mxu0 }
0x1c56   : > { %v2781_v52 = vpop.f32.mrb[58].mxu0 }
0x1c57   : > { %v4436_v53 = vpop.f32.mrb[59].mxu0  ;;  %v2786_v16 = vmul.f32 %v5428_v50, %v5428_v50 }
0x1c58   : > { %v4661_v53 = vld [vmem:[%s5679_s20 + $0x10] sm:$0xff]  }
0x1c59   : > { %v2787_v61 = vsel %vm853_vm0, %v2786_v16, 0.0 }
0x1c5a   : > { %2788 = vadd.xlane.f32.xlu0 %v2787_v61 }
0x1ce7   : > { %v2789_v56 = vpop.xlane.xlu0 %2788 }
0x1ce8   : > { %v2790_v62 = vmul.f32 0.03125, %v2789_v56  ;;  %v4662_v56 = vld [vmem:[%s5679_s20 + $0x18] sm:$0xff]  }
0x1cea   : > { %v2791_v2 = vadd.f32 1e-06, %v2790_v62 }
0x1cec   : > { %4713 = vrsqrt.f32 %v2791_v2 }
0x1cf6   : > { %v4714_v3 = vpop.eup %4713 }
0x1cf7   : > { %v2793_v11 = vmul.f32 %v4714_v3, %v5428_v50 }
0x1cf9   : > { %v2798_v14 = vmul.f32 %v3972_v12, %v2793_v11 }
0x1cfb   : > { %v2804_v15 = vpack.c.bf16 %v2798_v14, %v2798_v14 }
0x1cfd   : > { %4442 = vmatmul.mubr.msk.bf16.vlgmr.msra.gmra.mrb[40].mxu1 %vm853_vm0, %v2804_v15 }
0x1cfe   : > { %4449 = vmatprep.mubr.msk.bf16.mxu1 %vm4742_vm1, %v4741_v5 }
0x1dd0   : > { %v2854_v17 = vpop.f32.mrb[40].mxu1 }
0x1dd1   : > { %v4443_v25 = vpop.f32.mrb[41].mxu1  ;;  %v2867_v27 = vmul.f32 %v2854_v17, %v5234_v4  ;;  %v2868_v28 = vmul.f32 %v2854_v17, %v5241_v13  ;;  %v2865_v29 = vmul.f32 %v2854_v17, %v5230_v47  ;;  %v2866_v30 = vmul.f32 %v2854_v17, %v5224_v55 }
0x1dd2   : > { %v2857_v31 = vpop.f32.mrb[42].mxu1  ;;  %v2869_v34 = vmul.f32 %v2854_v17, %v5226_v23  ;;  %v2870_v45 = vmul.f32 %v2854_v17, %v5228_v26  ;;  %v2871_v4 = vmul.f32 %v2854_v17, %v5232_v1  ;;  %v2872_v13 = vmul.f32 %v2854_v17, %v5239_v10 }
0x1dd3   : > { %v4444_v59 = vpop.f32.mrb[43].mxu1  ;;  %v2875_v32 = vpack.c.bf16 %v2868_v28, %v2867_v27  ;;  %v2874_v33 = vpack.c.bf16 %v2866_v30, %v2865_v29  ;;  %v2873_v1 = vpack.c.bf16 %v2854_v17, %v2854_v17  ;;  %v4729_v29 = vld [vmem:[%s5722_s3] sm:$0xff]  ;;  %v4730_v31 = vld [vmem:[%s5722_s3 + $0x8] sm:$0xff] }
0x1dd4   : > { %v3013_v6 = vpack.c.bf16 %v2870_v45, %v2869_v34  ;;  %v3014_v55 = vpack.c.bf16 %v2872_v13, %v2871_v4 }
0x1dd5   : > { %2880 = vrot.lane.b32.xlu0 %v2875_v32, %s5729_s1  ;;  %2878 = vrot.lane.b32.xlu1 %v2874_v33, %s5729_s1  ;;  %v3990_v33 = vld [vmem:[%s5677_s18 + $0x1] ss:$0 sm:$0xff] }
0x1dd9   : > { %3017 = vrot.lane.b32.xlu0 %v3013_v6, %s5730_s11 }
0x1ddd   : > { %3019 = vrot.lane.b32.xlu0 %v3014_v55, %s5730_s11  ;;  %v4731_v55 = vld [vmem:[%s5722_s3 + $0x10] sm:$0xff] }
0x1e47   : > { %v2879_v47 = vpop.permute.xlu1 %2878  ;;  %v2881_v23 = vpop.permute.xlu0 %2880 }
0x1e48   : > { %v2886_v7 = vsel %vm853_vm0, %v2879_v47, 0  ;;  %v2889_v26 = vsel %vm853_vm0, %v2881_v23, 0 }
0x1e49   : > { %4446 = vmatpush3.bf16.xpose.msra.mxu1 %v2886_v7  ;;  %v4732_v7 = vld [vmem:[%s5722_s3 + $0x18] sm:$0xff] }
0x1e4a   : > { %4447 = vmatprep.subr.bf16.mxu1 %v4741_v5 }
0x1e4b   : > { %v3018_v40 = vpop.permute.xlu0 %3017 }
0x1e51   : > { %4448 = vmatpush3.bf16.xpose.msra.mxu1 %v2889_v26 }
0x1e52   : > { %4472 = vmatprep.subr.bf16.mxu1 %v4741_v5 }
0x1e58   : > { %4450 = vmatmul.mubr.msk.bf16.vlgmr.msra.gmra.mrb[44].mxu1 %vm853_vm0, %v2873_v1 }
0x1e59   : > { %4476 = vmatprep.mubr.msk.bf16.mxu1 %vm4742_vm1, %v4741_v5  ;;  %4473 = vmatpush3.bf16.msra.mxu1 %v4659_v21 }
0x1e5a   : > { %4474 = vmatprep.subr.bf16.mxu1 %v4741_v5 }
0x1e5d   : > { %4475 = vmatpush3.bf16.msra.mxu1 %v4660_v42 }
0x1e5e   : > { %4488 = vmatprep.subr.bf16.mxu1 %v4741_v5 }
0x1f2b   : > { %v2925_v10 = vpop.f32.mrb[44].mxu1 }
0x1f2c   : > { %v2926_v35 = vadd.f32 %v2925_v10, %v5267_v46  ;;  %v4451_v36 = vpop.f32.mrb[45].mxu1  ;;  %v3020_v46 = vpop.permute.xlu0 %3019 }
0x1f2d   : > { %v2928_v37 = vpop.f32.mrb[46].mxu1 }
0x1f2e   : > { %v4452_v0 = vpop.f32.mrb[47].mxu1  ;;  %v2931_v38 = vsel %vm853_vm0, %v2926_v35, -inf }
0x1f2f   : > { %2932 = vmax.xlane.f32.xlu1 %v2931_v38 }
0x1fbc   : > { %v2933_v39 = vpop.xlane.xlu1 %2932 }
0x1fbd   : > { %v2934_v8 = vsub.f32 %v2926_v35, %v2933_v39 }
0x1fbf   : > { %v2935_v9 = vmul.f32 1.442695, %v2934_v8 }
0x1fc1   : > { %4715 = vpow2.f32 %v2935_v9 }
0x1fcb   : > { %v4716_v41 = vpop.eup %4715 }
0x1fcc   : > { %4462 = vmatmul.mubr.msk.f32.vlgmr.msra.gmra.mrb[60].mxu0 %vm853_vm0, %v4716_v41 }
0x1fcd   : > { %4465 = vmatpush3.bf16.msra.mxu0 %v3018_v40  ;;  %4468 = vmatprep.mubr.msk.bf16.mxu0 %vm4742_vm1, %v4741_v5 }
0x1fce   : > { %4466 = vmatprep.subr.bf16.mxu0 %v4741_v5 }
0x1fd1   : > { %4467 = vmatpush3.bf16.msra.mxu0 %v3020_v46 }
0x1fd2   : > { %4480 = vmatprep.subr.bf16.mxu0 %v4741_v5 }
0x209f   : > { %v3006_v19 = vpop.f32.mrb[60].mxu0 }
0x20a0   : > { %4717 = vrcp.f32 %v3006_v19  ;;  %v4463_v44 = vpop.f32.mrb[61].mxu0 }
0x20aa   : > { %v4718_v48 = vpop.eup %4717 }
0x20ab   : > { %v3011_v49 = vmul.f32 %v4718_v48, %v4716_v41 }
0x20ad   : > { %v3012_v51 = vpack.c.bf16 %v3011_v49, %v3011_v49 }
0x20af   : > { %4469 = vmatmul.mubr.msk.bf16.vlgmr.msra.gmra.mrb[64].mxu0 %vm853_vm0, %v3012_v51 }
0x20b0   : > { %4484 = vmatprep.mubr.msk.bf16.mxu0 %vm4742_vm1, %v4741_v5 }
0x2182   : > { %v3060_v52 = vpop.f32.mrb[64].mxu0 }
0x2183   : > { %v3066_v16 = vpack.c.bf16 %v3060_v52, %v3060_v52  ;;  %v4470_v61 = vpop.f32.mrb[65].mxu0 }
0x2184   : > { %v3063_v54 = vpop.f32.mrb[66].mxu0 }
0x2185   : > { %v4471_v63 = vpop.f32.mrb[67].mxu0  ;;  %4477 = vmatmul.mubr.msk.bf16.vlgmr.msra.gmra.mrb[48].mxu1 %vm853_vm0, %v3066_v16 }
0x2186   : > { %4489 = vmatpush3.bf16.msra.mxu1 %v4661_v53  ;;  %4492 = vmatprep.mubr.msk.bf16.mxu1 %vm4742_vm1, %v4741_v5 }
0x2187   : > { %4490 = vmatprep.subr.bf16.mxu1 %v4741_v5 }
0x218a   : > { %4491 = vmatpush3.bf16.msra.mxu1 %v4662_v56 }
0x218b   : > { %4601 = vmatprep.subr.bf16.mxu1 %v4746_v57 }
0x218d   : > { %4493 = vmatmul.mubr.msk.bf16.vlgmr.msra.gmra.mrb[52].mxu1 %vm853_vm0, %v5320_v43 }
0x218e   : > { %4603 = vmatpush3.bf16.msra.mxu1 %v5014_v58  ;;  %4512 = vmatprep.mubr.msk.f32.mxu1 %vm4742_vm1, %v4741_v5 }
0x218f   : > { %4604 = vmatprep.subr.bf16.mxu1 %v4746_v57 }
0x2192   : > { %4606 = vmatpush3.bf16.msra.mxu1 %v5020_v60  ;;  %v4663_v60 = vld [vmem:[%s5678_s19 + $0x10] sm:$0xff]  }
0x2193   : > { %4515 = vmatprep.subr.bf16.mxu1 %v4741_v5  ;;  %4481 = vmatpush3.bf16.msra.mxu0 %v4663_v60 }
0x2194   : > { %4482 = vmatprep.subr.bf16.mxu0 %v4741_v5 }
0x2258   : > { %v3116_v62 = vpop.f32.mrb[48].mxu1 }
0x2259   : > { %v5505_v2 = vadd.f32 %v3116_v62, %v5428_v50  ;;  %v4478_v3 = vpop.f32.mrb[49].mxu1  ;;  %v4664_v50 = vld [vmem:[%s5678_s19 + $0x18] sm:$0xff]  }
0x225a   : > { %v3119_v12 = vpop.f32.mrb[50].mxu1  ;;  %4483 = vmatpush3.bf16.msra.mxu0 %v4664_v50  ;;  %v4667_v50 = vld [vmem:[%s5682_s23 + $0x10] sm:$0xff]  }
0x225b   : > { %v4479_v11 = vpop.f32.mrb[51].mxu1  ;;  %v3124_v43 = vmul.f32 %v5505_v2, %v5505_v2  ;;  %4496 = vmatprep.subr.bf16.mxu0 %v4741_v5 }
0x225d   : > { %v3125_v58 = vsel %vm853_vm0, %v3124_v43, 0.0 }
0x225e   : > { %3126 = vadd.xlane.f32.xlu0 %v3125_v58 }
0x2260   : > { %v3249_v14 = vpop.f32.mrb[52].mxu1 }
0x2261   : > { %v4494_v15 = vpop.f32.mrb[53].mxu1  ;;  %v3260_v30 = vmul.f32 %v4729_v29, %v3249_v14  ;;  %v3261_v59 = vmul.f32 %v4730_v31, %v3249_v14  ;;  %v3262_v47 = vmul.f32 %v4731_v55, %v3249_v14  ;;  %v3263_v23 = vmul.f32 %v4732_v7, %v3249_v14 }
0x2262   : > { %v3252_v57 = vpop.f32.mrb[54].mxu1  ;;  %v3264_v41 = vmul.f32 %v3249_v14, %v4963_v18  ;;  %v3265_v46 = vmul.f32 %v3249_v14, %v4967_v20  ;;  %v3266_v42 = vmul.f32 %v3249_v14, %v4971_v22  ;;  %v3267_v19 = vmul.f32 %v3249_v14, %v4975_v24  ;;  %v4665_v20 = vld [vmem:[%s5680_s21 + $0x10] sm:$0xff]   ;;  %v4666_v22 = vld [vmem:[%s5680_s21 + $0x18] sm:$0xff]  }
0x2263   : > { %v4495_v17 = vpop.f32.mrb[55].mxu1  ;;  %v3269_v6 = vpack.c.bf16 %v3261_v59, %v3260_v30  ;;  %v3270_v26 = vpack.c.bf16 %v3263_v23, %v3262_v47 }
0x2264   : > { %v3402_v21 = vpack.c.bf16 %v3265_v46, %v3264_v41  ;;  %v3403_v44 = vpack.c.bf16 %v3267_v19, %v3266_v42 }
0x2265   : > { %v3275_v13 = vsel %vm853_vm0, %v3269_v6, 0  ;;  %v3278_v1 = vsel %vm853_vm0, %v3270_v26, 0  ;;  %v4672_v6 = vld [vmem:[%s5683_s24 + $0x38] sm:$0xff]   ;;  %v4673_v26 = vld [vmem:[%s5685_s26] sm:$0xff]  }
0x22eb   : > { %v3127_v25 = vpop.xlane.xlu0 %3126 }
0x22ec   : > { %v3128_v27 = vmul.f32 0.03125, %v3127_v25  ;;  %v4668_v25 = vld [vmem:[%s5682_s23 + $0x18] sm:$0xff]  }
0x22ee   : > { %v3129_v28 = vadd.f32 1e-06, %v3128_v27  ;;  %v4670_v27 = vld [vmem:[%s5683_s24 + $0x28] sm:$0xff]  }
0x22f0   : > { %4719 = vrsqrt.f32 %v3129_v28  ;;  %v4671_v28 = vld [vmem:[%s5683_s24 + $0x30] sm:$0xff]  }
0x22fa   : > { %v4720_v32 = vpop.eup %4719 }
0x22fb   : > { %v3131_v34 = vmul.f32 %v4720_v32, %v5505_v2  ;;  %v4015_v32 = vld [vmem:[%s5681_s22 + $0x1] ss:$0 sm:$0xff] }
0x22fd   : > { %v3136_v45 = vmul.f32 %v3990_v33, %v3131_v34 }
0x22ff   : > { %v3142_v4 = vpack.c.bf16 %v3136_v45, %v3136_v45 }
0x2301   : > { %4485 = vmatmul.mubr.msk.bf16.vlgmr.msra.gmra.mrb[68].mxu0 %vm853_vm0, %v3142_v4 }
0x2302   : > { %4497 = vmatpush3.bf16.xpose.msra.mxu0 %v3275_v13  ;;  %4500 = vmatprep.mubr.msk.bf16.mxu0 %vm4742_vm1, %v4741_v5 }
0x2303   : > { %4498 = vmatprep.subr.bf16.mxu0 %v4741_v5 }
0x230a   : > { %4499 = vmatpush3.bf16.xpose.msra.mxu0 %v3278_v1  ;;  %v3744_v1 = vsel %vm853_vm0, %v4673_v26, 0 }
0x230b   : > { %4523 = vmatprep.subr.bf16.mxu0 %v4741_v5 }
0x23d4   : > { %v3192_v10 = vpop.f32.mrb[68].mxu0 }
0x23d5   : > { %v3268_v35 = vpack.c.bf16 %v3192_v10, %v3192_v10  ;;  %v4486_v36 = vpop.f32.mrb[69].mxu0  ;;  %v4674_v10 = vld [vmem:[%s5685_s26 + $0x8] sm:$0xff]  }
0x23d6   : > { %v3195_v37 = vpop.f32.mrb[70].mxu0  ;;  %v4675_v36 = vld [vmem:[%s5685_s26 + $0x10] sm:$0xff]  }
0x23d7   : > { %v4487_v0 = vpop.f32.mrb[71].mxu0  ;;  %4501 = vmatmul.mubr.msk.bf16.vlgmr.msra.gmra.mrb[72].mxu0 %vm853_vm0, %v3268_v35  ;;  %v3747_v35 = vsel %vm853_vm0, %v4674_v10, 0  ;;  %v3750_v37 = vsel %vm853_vm0, %v4675_v36, 0 }
0x23d8   : > { %4527 = vmatprep.mubr.msk.bf16.mxu0 %vm4742_vm1, %v4741_v5  ;;  %4524 = vmatpush3.bf16.msra.mxu0 %v4665_v20  ;;  %v4676_v0 = vld [vmem:[%s5685_s26 + $0x18] sm:$0xff]  }
0x23d9   : > { %4525 = vmatprep.subr.bf16.mxu0 %v4741_v5 }
0x23dc   : > { %4526 = vmatpush3.bf16.msra.mxu0 %v4666_v22 }
0x23dd   : > { %4539 = vmatprep.subr.bf16.mxu0 %v4741_v5 }
0x24aa   : > { %v3314_v38 = vpop.f32.mrb[72].mxu0 }
0x24ab   : > { %v4502_v39 = vpop.f32.mrb[73].mxu0  ;;  %v3320_v8 = vsel %vm853_vm0, %v3314_v38, -inf }
0x24ac   : > { %3321 = vmax.xlane.f32.xlu1 %v3320_v8  ;;  %v3317_v9 = vpop.f32.mrb[74].mxu0  ;;  %v4677_v39 = vld [vmem:[%s5685_s26 + $0x20] sm:$0xff]  }
0x24ad   : > { %v4503_v40 = vpop.f32.mrb[75].mxu0  ;;  %v3756_v8 = vsel %vm853_vm0, %v4677_v39, 0 }
0x24bd   : > { %3406 = vrot.lane.b32.xlu1 %v3402_v21, %s5729_s1 }
0x24c1   : > { %3408 = vrot.lane.b32.xlu1 %v3403_v44, %s5729_s1  ;;  %v4678_v44 = vld [vmem:[%s5685_s26 + $0x28] sm:$0xff]  }
0x2539   : > { %v3322_v48 = vpop.xlane.xlu1 %3321 }
0x253a   : > { %v3323_v49 = vsub.f32 %v3314_v38, %v3322_v48  ;;  %v3753_v38 = vsel %vm853_vm0, %v4676_v0, 0  ;;  %v3759_v48 = vsel %vm853_vm0, %v4678_v44, 0 }
0x253c   : > { %v3324_v51 = vmul.f32 1.442695, %v3323_v49  ;;  %v4679_v49 = vld [vmem:[%s5685_s26 + $0x30] sm:$0xff]  }
0x253d   : > { %v3407_v52 = vpop.permute.xlu1 %3406 }
0x253e   : > { %4721 = vpow2.f32 %v3324_v51  ;;  %v3762_v51 = vsel %vm853_vm0, %v4679_v49, 0 }
0x2541   : > { %v3409_v18 = vpop.permute.xlu1 %3408 }
0x2548   : > { %v4722_v53 = vpop.eup %4721 }
0x2549   : > { %4513 = vmatmul.mubr.msk.f32.vlgmr.msra.gmra.mrb[56].mxu1 %vm853_vm0, %v4722_v53 }
0x254a   : > { %4516 = vmatpush3.bf16.msra.mxu1 %v3407_v52  ;;  %4519 = vmatprep.mubr.msk.bf16.mxu1 %vm4742_vm1, %v4741_v5  ;;  %v4680_v52 = vld [vmem:[%s5685_s26 + $0x38] sm:$0xff]  }
0x254b   : > { %4517 = vmatprep.subr.bf16.mxu1 %v4741_v5 }
0x254e   : > { %4518 = vmatpush3.bf16.msra.mxu1 %v3409_v18 }
0x254f   : > { %4531 = vmatprep.subr.bf16.mxu1 %v4741_v5 }
0x261c   : > { %v3395_v24 = vpop.f32.mrb[56].mxu1 }
0x261d   : > { %4723 = vrcp.f32 %v3395_v24  ;;  %v4514_v16 = vpop.f32.mrb[57].mxu1 }
0x261e   : > { %v4036_v16 = vld [vmem:[%s5684_s25] ss:$0 sm:$0xff] }
0x2627   : > { %v4724_v61 = vpop.eup %4723 }
0x2628   : > { %v3400_v54 = vmul.f32 %v4724_v61, %v4722_v53  ;;  %v3765_v53 = vsel %vm853_vm0, %v4680_v52, 0 }
0x262a   : > { %v3401_v63 = vpack.c.bf16 %v3400_v54, %v3400_v54 }
0x262c   : > { %4520 = vmatmul.mubr.msk.bf16.vlgmr.msra.gmra.mrb[60].mxu1 %vm853_vm0, %v3401_v63 }
0x262d   : > { %4535 = vmatprep.mubr.msk.bf16.mxu1 %vm4742_vm1, %v4741_v5  ;;  %4532 = vmatpush3.bf16.msra.mxu1 %v4667_v50 }
0x262e   : > { %4533 = vmatprep.subr.bf16.mxu1 %v4741_v5 }
0x2631   : > { %4534 = vmatpush3.bf16.msra.mxu1 %v4668_v25 }
0x2632   : > { %4551 = vmatprep.subr.bf16.mxu1 %v4741_v5 }
0x26ff   : > { %v3449_v56 = vpop.f32.mrb[60].mxu1 }
0x2700   : > { %v3455_v62 = vpack.c.bf16 %v3449_v56, %v3449_v56  ;;  %v4521_v3 = vpop.f32.mrb[61].mxu1 }
0x2701   : > { %v3452_v12 = vpop.f32.mrb[62].mxu1 }
0x2702   : > { %v4522_v11 = vpop.f32.mrb[63].mxu1  ;;  %4528 = vmatmul.mubr.msk.bf16.vlgmr.msra.gmra.mrb[76].mxu0 %vm853_vm0, %v3455_v62 }
0x2703   : > { %4547 = vmatprep.mubr.msk.bf16.mxu0 %vm4742_vm1, %v4741_v5 }
0x27d5   : > { %v3505_v43 = vpop.f32.mrb[76].mxu0 }
0x27d6   : > { %v5571_v58 = vadd.f32 %v3505_v43, %v5505_v2  ;;  %v4529_v14 = vpop.f32.mrb[77].mxu0  ;;  %v4669_v2 = vld [vmem:[%s5683_s24 + $0x20] sm:$0xff]  }
0x27d7   : > { %v3508_v15 = vpop.f32.mrb[78].mxu0  ;;  %4540 = vmatpush3.bf16.msra.mxu0 %v4669_v2 }
0x27d8   : > { %v4530_v57 = vpop.f32.mrb[79].mxu0  ;;  %v3513_v17 = vmul.f32 %v5571_v58, %v5571_v58  ;;  %4541 = vmatprep.subr.bf16.mxu0 %v4741_v5 }
0x27da   : > { %v3514_v60 = vsel %vm853_vm0, %v3513_v17, 0.0 }
0x27db   : > { %3515 = vadd.xlane.f32.xlu0 %v3514_v60  ;;  %4542 = vmatpush3.bf16.msra.mxu0 %v4670_v27 }
0x27dc   : > { %4543 = vmatprep.subr.bf16.mxu0 %v4741_v5 }
0x27df   : > { %4544 = vmatpush3.bf16.msra.mxu0 %v4671_v28 }
0x27e0   : > { %4545 = vmatprep.subr.bf16.mxu0 %v4741_v5 }
0x27e3   : > { %4546 = vmatpush3.bf16.msra.mxu0 %v4672_v6 }
0x2868   : > { %v3516_v29 = vpop.xlane.xlu0 %3515 }
0x2869   : > { %v3517_v30 = vmul.f32 0.03125, %v3516_v29 }
0x286b   : > { %v3518_v31 = vadd.f32 1e-06, %v3517_v30 }
0x286d   : > { %4725 = vrsqrt.f32 %v3518_v31 }
0x2877   : > { %v4726_v59 = vpop.eup %4725 }
0x2878   : > { %v3520_v33 = vmul.f32 %v4726_v59, %v5571_v58 }
0x287a   : > { %v3525_v34 = vmul.f32 %v4015_v32, %v3520_v33 }
0x287c   : > { %v3531_v45 = vpack.c.bf16 %v3525_v34, %v3525_v34 }
0x287e   : > { %4536 = vmatmul.mubr.msk.bf16.vlgmr.msra.gmra.mrb[64].mxu1 %vm853_vm0, %v3531_v45 }
0x287f   : > { %4567 = vmatprep.mubr.msk.bf16.mxu1 %vm4742_vm1, %v4741_v5  ;;  %4552 = vmatpush3.bf16.xpose.msra.mxu1 %v3744_v1 }
0x2880   : > { %4553 = vmatprep.subr.bf16.mxu1 %v4741_v5 }
0x2887   : > { %4554 = vmatpush3.bf16.xpose.msra.mxu1 %v3747_v35 }
0x2888   : > { %4555 = vmatprep.subr.bf16.mxu1 %v4741_v5 }
0x288f   : > { %4556 = vmatpush3.bf16.xpose.msra.mxu1 %v3750_v37 }
0x2890   : > { %4557 = vmatprep.subr.bf16.mxu1 %v4741_v5 }
0x2897   : > { %4558 = vmatpush3.bf16.xpose.msra.mxu1 %v3753_v38 }
0x2898   : > { %4559 = vmatprep.subr.bf16.mxu1 %v4741_v5 }
0x289f   : > { %4560 = vmatpush3.bf16.xpose.msra.mxu1 %v3756_v8 }
0x28a0   : > { %4561 = vmatprep.subr.bf16.mxu1 %v4741_v5 }
0x28a7   : > { %4562 = vmatpush3.bf16.xpose.msra.mxu1 %v3759_v48 }
0x28a8   : > { %4563 = vmatprep.subr.bf16.mxu1 %v4741_v5 }
0x28af   : > { %4564 = vmatpush3.bf16.xpose.msra.mxu1 %v3762_v51 }
0x28b0   : > { %4565 = vmatprep.subr.bf16.mxu1 %v4741_v5 }
0x28b7   : > { %4566 = vmatpush3.bf16.xpose.msra.mxu1 %v3765_v53 }
0x2951   : > { %v3581_v4 = vpop.f32.mrb[64].mxu1 }
0x2952   : > { %v3587_v13 = vmax.f32 %v3581_v4, 0.0  ;;  %v4537_v55 = vpop.f32.mrb[65].mxu1 }
0x2953   : > { %v3584_v47 = vpop.f32.mrb[66].mxu1 }
0x2954   : > { %v3597_v7 = vpack.c.bf16 %v3587_v13, %v3587_v13  ;;  %v4538_v23 = vpop.f32.mrb[67].mxu1 }
0x2956   : > { %4548 = vmatmul.mubr.msk.bf16.vlgmr.msra.gmra.mrb[80].mxu0 %vm1325_vm2, %v3597_v7 }
0x2a29   : > { %v3659_v9 = vpop.f32.mrb[80].mxu0 }
0x2a2a   : > { %v3665_v40 = vadd.f32 %v3659_v9, %v5571_v58  ;;  %v4549_v41 = vpop.f32.mrb[81].mxu0 }
0x2a2b   : > { %v3662_v46 = vpop.f32.mrb[82].mxu0 }
0x2a2c   : > { %v4550_v21 = vpop.f32.mrb[83].mxu0  ;;  %v3667_v42 = vmul.f32 %v3665_v40, %v3665_v40 }
0x2a2e   : > { %v3668_v19 = vsel %vm853_vm0, %v3667_v42, 0.0 }
0x2a2f   : > { %3669 = vadd.xlane.f32.xlu1 %v3668_v19 }
0x2abc   : > { %v3670_v18 = vpop.xlane.xlu1 %3669 }
0x2abd   : > { %v3671_v20 = vmul.f32 0.03125, %v3670_v18 }
0x2abf   : > { %v3672_v22 = vadd.f32 1e-06, %v3671_v20 }
0x2ac1   : > { %4727 = vrsqrt.f32 %v3672_v22 }
0x2acb   : > { %v4728_v24 = vpop.eup %4727 }
0x2acc   : > { %v3674_v61 = vmul.f32 %v4728_v24, %v3665_v40 }
0x2ace   : > { %v3681_v54 = vmul.f32 %v4036_v16, %v3674_v61 }
0x2ad0   : > { %v3682_v63 = vmul.f32 0.17677669, %v3681_v54 }
0x2ad2   : > { %v3683_v5 = vpack.c.bf16 %v3682_v63, %v3682_v63 }
0x2ad4   : > { %4568 = vmatmul.mubr.msk.bf16.vlgmr.msra.gmra.mrb[68].mxu1 %vm853_vm0, %v3683_v5 }
0x2ba7   : > { %v3801_v56 = vpop.f32.mrb[68].mxu1 }
0x2ba8   : > { %3807 = vst [vmem:[%s830_s4] sm:$0xff] %v3801_v56  ;;  %v4569_v62 = vpop.f32.mrb[69].mxu1 }
0x2ba9   : > { %v3804_v3 = vpop.f32.mrb[70].mxu1 }
0x2baa   : > { %v4570_v12 = vpop.f32.mrb[71].mxu1 }
0x2bab PF: > { %s5736_s30 = sld [smem:[#allocation2_spill]] }
0x2bb1   : > { %s37_s7 = sadd.s32 1, %s5736_s30  }
0x2bb2   : > { %p34_p4 = scmp.ge.s32.totalorder %s37_s7, 4  }
0x2bb4   :  { %36 = sbr.rel (!%p34_p4) target bundleno = 14 (0xe), region = 172 }

</bundles_post_ra>
